<compile_context>
chip_gen: v5e
topology: v5e:2x2
jax: 0.10.0
libtpu: 0.0.40
codegen_flags: <defaults>
</compile_context>

<pallas_src>
import functools

import numpy as np

import jax
import jax.numpy as jnp
from jax.experimental import pallas as pl
from jax.experimental.pallas import tpu as pltpu


# ---------------------------------------------------------------------------
# Pallas kernels
# ---------------------------------------------------------------------------
def _matmul_bn_kernel(x_ref, w_ref, shift_ref, o_ref, *, relu_out):
    """out = maybe_relu( x @ W' + shift ), W' has the BN scale pre-folded."""
    y = jnp.dot(x_ref[...], w_ref[...], preferred_element_type=jnp.float32)
    y = y + shift_ref[...]
    if relu_out:
        y = jnp.maximum(y, 0.0)
    o_ref[...] = y.astype(o_ref.dtype)


def _conv2_residual_stack_kernel(p2_ref, w2_ref, shift2_ref, g_ref, w3_ref,
                                 w1_ref, o_ref, *, num_layers):
    """conv2 + bn2 prologue + the whole residual stack, resident in VMEM/vregs.

        x = p2 @ W2' + shift2                       (conv2 + eval BN, scale folded)
        repeat L times:
          xr  = relu(x)  (bf16 for the MXU)
          h   = relu( sum_t (G[t] @ xr) @ W3[l,t] ) (3x3 conv via one-hot gathers)
          x   = x + h @ W1[l]                       (1x1 conv, kept in f32)
        out = relu(x)                               (final stack ReLU)
    """
    x = jnp.dot(p2_ref[...], w2_ref[...], preferred_element_type=jnp.float32)
    x = x + shift2_ref[...]                                     # (M, H) f32
    for l in range(num_layers):
        xr = jnp.maximum(x, 0.0).astype(jnp.bfloat16)           # (M, H) bf16
        h = None
        for t in range(9):
            # One-hot gather: exact, values stay bf16 after the cast back.
            g_t = jnp.dot(g_ref[t], xr,
                          preferred_element_type=jnp.float32).astype(jnp.bfloat16)
            ht = jnp.dot(g_t, w3_ref[l, t],
                         preferred_element_type=jnp.float32)    # (M, Rh) f32
            h = ht if h is None else h + ht
        h = jnp.maximum(h, 0.0)
        # 1x1 conv kept in f32 (Rh is tiny) -> no second bf16 quantisation.
        x = x + jnp.dot(h, w1_ref[l], preferred_element_type=jnp.float32)
    o_ref[...] = jnp.maximum(x, 0.0).astype(o_ref.dtype)


# ---------------------------------------------------------------------------
# Tiling / padding helpers
# ---------------------------------------------------------------------------
def _tile_rows(m, max_tile=256):
    """Pad rows to a multiple of 16 (bf16 sublane packing).  Small maps use a
    single tile (v5e/v6e are single-TC, a forced split is pure overhead);
    large maps split into `max_tile`-row tiles (gives v7x's 2 TCs work and
    keeps per-step VMEM small)."""
    mp = -(-m // 16) * 16
    tm = mp if mp <= 2 * max_tile else max_tile
    mp = -(-mp // tm) * tm
    return mp, tm


def _pad_rows(a, mp):
    m = a.shape[0]
    if mp == m:
        return a
    return jnp.pad(a, ((0, mp - m), (0, 0)))


# ---------------------------------------------------------------------------
# pallas_call wrappers
# ---------------------------------------------------------------------------
def conv_bn_matmul(patches, w, shift, *, relu_out=False, out_dtype=jnp.float32):
    """patches: (M, K), w: (K, N) with BN scale folded in, shift: (N,)."""
    M, K = patches.shape
    Kw, N = w.shape
    assert K == Kw
    Mp, tm = _tile_rows(M)

    p = _pad_rows(patches.astype(jnp.bfloat16), Mp)
    wb = w.astype(jnp.bfloat16)
    shift2 = shift.reshape(1, N).astype(jnp.float32)

    kernel = functools.partial(_matmul_bn_kernel, relu_out=relu_out)
    out = pl.pallas_call(
        kernel,
        out_shape=jax.ShapeDtypeStruct((Mp, N), out_dtype),
        grid_spec=pltpu.PrefetchScalarGridSpec(
            num_scalar_prefetch=0,
            grid=(Mp // tm,),
            in_specs=[
                pl.BlockSpec((tm, K), lambda i: (i, 0)),   # patches (bf16)
                pl.BlockSpec((K, N), lambda i: (0, 0)),    # folded weight (bf16)
                pl.BlockSpec((1, N), lambda i: (0, 0)),    # shift (f32)
            ],
            out_specs=pl.BlockSpec((tm, N), lambda i: (i, 0)),
        ),
        compiler_params=pltpu.CompilerParams(dimension_semantics=("parallel",)),
    )(p, wb, shift2)
    return out[:M] if Mp != M else out


def conv2_residual_stack(p2, w2, shift2, gather, w3_stack, w1_stack, num_layers):
    """Single fused call: conv2+bn2 then `num_layers` residual layers + ReLU.

    p2:       (M, K2)  conv2 im2col patches (bf16-castable)
    w2:       (K2, H)  BN-folded conv2 weight
    shift2:   (H,)     BN shift
    gather:   (9, Mp, Mp) one-hot 3x3 tap gather matrices (bf16)
    w3_stack: (L, 9, H, Rh), w1_stack: (L, Rh, H)
    """
    M, K2 = p2.shape
    H = w2.shape[1]
    L, _, _, Rh = w3_stack.shape
    Mp = gather.shape[1]

    p = _pad_rows(p2.astype(jnp.bfloat16), Mp)
    kernel = functools.partial(_conv2_residual_stack_kernel, num_layers=num_layers)
    out = pl.pallas_call(
        kernel,
        out_shape=jax.ShapeDtypeStruct((Mp, H), jnp.float32),
        grid_spec=pltpu.PrefetchScalarGridSpec(
            num_scalar_prefetch=0,
            grid=(1,),    # spatially coupled by the 3x3 gather -> one block
            in_specs=[
                pl.BlockSpec((Mp, K2), lambda i: (0, 0)),            # patches bf16
                pl.BlockSpec((K2, H), lambda i: (0, 0)),             # W2 bf16
                pl.BlockSpec((1, H), lambda i: (0, 0)),              # shift2 f32
                pl.BlockSpec((9, Mp, Mp), lambda i: (0, 0, 0)),      # gather bf16
                pl.BlockSpec((L, 9, H, Rh), lambda i: (0, 0, 0, 0)),  # W3 bf16
                pl.BlockSpec((L, Rh, H), lambda i: (0, 0, 0)),       # W1 f32
            ],
            out_specs=pl.BlockSpec((Mp, H), lambda i: (0, 0)),
        ),
        compiler_params=pltpu.CompilerParams(dimension_semantics=("arbitrary",)),
    )(p, w2.astype(jnp.bfloat16), shift2.reshape(1, H).astype(jnp.float32),
      gather, w3_stack.astype(jnp.bfloat16), w1_stack.astype(jnp.float32))
    return out[:M] if Mp != M else out


# ---------------------------------------------------------------------------
# Glue: im2col, weight reshaping, BN folding, gather construction (trace-time)
# ---------------------------------------------------------------------------
def im2col(x_nhwc, kh, kw, stride, pad):
    N, H, W, C = x_nhwc.shape
    Ho = (H + 2 * pad - kh) // stride + 1
    Wo = (W + 2 * pad - kw) // stride + 1
    xp = jnp.pad(x_nhwc, ((0, 0), (pad, pad), (pad, pad), (0, 0)))
    cols = []
    for i in range(kh):
        for j in range(kw):
            cols.append(xp[:, i:i + stride * Ho:stride, j:j + stride * Wo:stride, :])
    patches = jnp.concatenate(cols, axis=-1)          # (N, Ho, Wo, kh*kw*C)
    return patches.reshape(N * Ho * Wo, kh * kw * C), (N, Ho, Wo)


def conv_weight_to_matmul(w_oihw):
    """(Cout, Cin, kh, kw) -> (kh*kw*Cin, Cout) matching im2col ordering."""
    Cout, Cin, kh, kw = w_oihw.shape
    return jnp.transpose(w_oihw, (2, 3, 1, 0)).reshape(kh * kw * Cin, Cout)


def fold_bn_into_weight(w_mat, conv_bias, gamma, beta, mean, var, eps=1e-5):
    """Return (W * scale, shift) so that  patches @ W' + shift == BN(conv)."""
    scale = gamma / jnp.sqrt(var + eps)
    bias = conv_bias if conv_bias is not None else jnp.zeros_like(mean)
    shift = beta + scale * (bias - mean)
    return w_mat * scale[None, :], shift


def build_conv3x3_gather(n, ho, wo, m_pad):
    """One-hot gather matrices G (9, m_pad, m_pad) for a 3x3/s1/p1 conv on the
    row-flattened (n*ho*wo, C) NHWC map.  G[t] @ x == x shifted to tap t, with
    zero rows at the zero-padding boundary and for padded rows."""
    g = np.zeros((9, m_pad, m_pad), np.float32)
    hw = ho * wo
    for b in range(n):
        for i in range(ho):
            for j in range(wo):
                m = b * hw + i * wo + j
                for ki in range(3):
                    for kj in range(3):
                        si, sj = i + ki - 1, j + kj - 1
                        if 0 <= si < ho and 0 <= sj < wo:
                            g[ki * 3 + kj, m, b * hw + si * wo + sj] = 1.0
    return jnp.asarray(g, jnp.bfloat16)


# ---------------------------------------------------------------------------
# Encoder
# ---------------------------------------------------------------------------
def init_encoder_params(key, num_hiddens, num_residual_layers, num_residual_hiddens):
    H, Rh = num_hiddens, num_residual_hiddens
    ks = list(jax.random.split(key, 6 + 2 * max(num_residual_layers, 1)))
    p = {
        "w1": jax.random.normal(ks[0], (H // 2, 1, 4, 4), jnp.float32) * 0.1,
        "b1": jax.random.normal(ks[1], (H // 2,), jnp.float32) * 0.1,
        "bn1_gamma": jnp.ones((H // 2,), jnp.float32),
        "bn1_beta": jax.random.normal(ks[2], (H // 2,), jnp.float32) * 0.1,
        "bn1_mean": jnp.zeros((H // 2,), jnp.float32),
        "bn1_var": jnp.ones((H // 2,), jnp.float32),
        "w2": jax.random.normal(ks[3], (H, H // 2, 4, 4), jnp.float32) * 0.1,
        "b2": jax.random.normal(ks[4], (H,), jnp.float32) * 0.1,
        "bn2_gamma": jnp.ones((H,), jnp.float32),
        "bn2_beta": jax.random.normal(ks[5], (H,), jnp.float32) * 0.1,
        "bn2_mean": jnp.zeros((H,), jnp.float32),
        "bn2_var": jnp.ones((H,), jnp.float32),
        "res_w3": [], "res_w1": [],
    }
    for l in range(num_residual_layers):
        p["res_w3"].append(jax.random.normal(ks[6 + 2 * l], (Rh, H, 3, 3), jnp.float32) * 0.1)
        p["res_w1"].append(jax.random.normal(ks[7 + 2 * l], (H, Rh, 1, 1), jnp.float32) * 0.1)
    return p


def encoder_forward(x_nchw, params, num_residual_layers):
    x = jnp.transpose(x_nchw, (0, 2, 3, 1))  # -> NHWC
    H = params["w2"].shape[0]
    Rh = params["res_w3"][0].shape[0] if num_residual_layers else 0

    # --- conv1 + bn1 + relu (pallas_call #1, bf16 output) ---
    patches, (N, Ho, Wo) = im2col(x, 4, 4, 2, 1)
    w = conv_weight_to_matmul(params["w1"])
    w, shift = fold_bn_into_weight(w, params["b1"], params["bn1_gamma"],
                                   params["bn1_beta"], params["bn1_mean"],
                                   params["bn1_var"])
    y = conv_bn_matmul(patches, w, shift, relu_out=True, out_dtype=jnp.bfloat16)
    x = y.reshape(N, Ho, Wo, H // 2)

    # --- conv2 patches (tiny, XLA im2col) feed the fused stack kernel ---
    patches, (N, Ho, Wo) = im2col(x, 4, 4, 2, 1)
    w2 = conv_weight_to_matmul(params["w2"])
    w2, shift2 = fold_bn_into_weight(w2, params["b2"], params["bn2_gamma"],
                                     params["bn2_beta"], params["bn2_mean"],
                                     params["bn2_var"])
    M = N * Ho * Wo

    if num_residual_layers == 0:
        # No residual layers: conv2 + bn2 + the stack's final ReLU only.
        y = conv_bn_matmul(patches, w2, shift2, relu_out=True)
        return jnp.transpose(y.reshape(N, Ho, Wo, H), (0, 3, 1, 2))

    # --- pallas_call #2: conv2+bn2 + the WHOLE residual stack, fused ---
    Mp = -(-M // 16) * 16
    gather = build_conv3x3_gather(N, Ho, Wo, Mp)
    w3_stack = jnp.stack(
        [conv_weight_to_matmul(w3).reshape(9, H, Rh) for w3 in params["res_w3"]])
    w1_stack = jnp.stack(
        [conv_weight_to_matmul(w1) for w1 in params["res_w1"]])
    y = conv2_residual_stack(patches, w2, shift2, gather, w3_stack, w1_stack,
                             num_residual_layers)
    x = y.reshape(N, Ho, Wo, H)
    return jnp.transpose(x, (0, 3, 1, 2))  # -> NCHW


# ---------------------------------------------------------------------------
# Pure-JAX reference (NCHW, mirrors the PyTorch module) for correctness check
# ---------------------------------------------------------------------------
def _ref_conv(x, w, b, stride, pad):
    out = jax.lax.conv_general_dilated(
        x, w, (stride, stride), [(pad, pad), (pad, pad)],
        dimension_numbers=("NCHW", "OIHW", "NCHW"))
    if b is not None:
        out = out + b[None, :, None, None]
    return out


def _ref_bn(x, gamma, beta, mean, var, eps=1e-5):
    return ((x - mean[None, :, None, None])
            / jnp.sqrt(var[None, :, None, None] + eps)
            * gamma[None, :, None, None] + beta[None, :, None, None])


def encoder_reference(x, p, num_residual_layers):
    x = jax.nn.relu(_ref_bn(_ref_conv(x, p["w1"], p["b1"], 2, 1),
                            p["bn1_gamma"], p["bn1_beta"], p["bn1_mean"], p["bn1_var"]))
    x = _ref_bn(_ref_conv(x, p["w2"], p["b2"], 2, 1),
                p["bn2_gamma"], p["bn2_beta"], p["bn2_mean"], p["bn2_var"])
    for l in range(num_residual_layers):
        h = jax.nn.relu(_ref_conv(jax.nn.relu(x), p["res_w3"][l], None, 1, 1))
        x = x + _ref_conv(h, p["res_w1"][l], None, 1, 0)
    return jax.nn.relu(x)


# ---------------------------------------------------------------------------
if __name__ == "__main__":
    num_hiddens = 32
    num_residual_layers = 2
    num_residual_hiddens = 8

    key = jax.random.PRNGKey(0)
    k_in, k_par = jax.random.split(key)
    x = jax.random.normal(k_in, (2, 1, 16, 16), jnp.float32)  # NCHW, in_channels=1
    params = init_encoder_params(k_par, num_hiddens, num_residual_layers,
                                 num_residual_hiddens)

    fwd = jax.jit(lambda xx, pp: encoder_forward(xx, pp, num_residual_layers))
    out = jax.block_until_ready(fwd(x, params))

    ref = jax.block_until_ready(encoder_reference(x, params, num_residual_layers))
    assert out.shape == (2, num_hiddens, 4, 4), out.shape
    # bf16 MXU operands with f32 accumulation -> loosened tolerance vs f32 ref.
    assert jnp.allclose(out, ref, rtol=5e-2, atol=5e-2), \
        float(jnp.max(jnp.abs(out - ref)))

    print("KERNEL_OK")
</pallas_src>

<mosaic_0001>
module attributes {stable_mosaic.version = 11 : i64} {
  func.func @_matmul_bn_kernel(%arg0: i32, %arg1: memref<128x16xbf16, #tpu.memory_space<vmem>>, %arg2: memref<16x16xbf16, #tpu.memory_space<vmem>>, %arg3: memref<1x16xf32, #tpu.memory_space<vmem>>, %arg4: memref<128x16xbf16, #tpu.memory_space<vmem>>) attributes {dimension_semantics = [#tpu.dimension_semantics<parallel>], iteration_bounds = array<i64: 1>, scalar_prefetch = 0 : i64, scratch_operands = 0 : i64, tpu.core_type = #tpu.core_type<tc>, window_params = [{transform_indices = @transform_0, window_bounds = array<i64: 128, 16>}, {pipeline_mode = #tpu.pipeline_mode<synchronous>, transform_indices = @transform_1, window_bounds = array<i64: 16, 16>}, {pipeline_mode = #tpu.pipeline_mode<synchronous>, transform_indices = @transform_2, window_bounds = array<i64: 1, 16>}, {transform_indices = @transform_3, window_bounds = array<i64: 128, 16>}]} {
    %c0 = arith.constant 0 : index
    %c0_0 = arith.constant 0 : index
    %0 = vector.load %arg1[%c0, %c0_0] : memref<128x16xbf16, #tpu.memory_space<vmem>>, vector<128x16xbf16>
    %c0_1 = arith.constant 0 : index
    %c0_2 = arith.constant 0 : index
    %1 = vector.load %arg2[%c0_1, %c0_2] : memref<16x16xbf16, #tpu.memory_space<vmem>>, vector<16x16xbf16>
    %cst = arith.constant dense<0.000000e+00> : vector<128x16xf32>
    %2 = tpu.matmul %0, %1, %cst {dimension_numbers = #tpu.dot_dimension_numbers<[1], [0], [0], [1], [0, 0, 1, 1], [], []>} : vector<128x16xbf16>, vector<16x16xbf16>, vector<128x16xf32> -> vector<128x16xf32>
    %c0_3 = arith.constant 0 : index
    %c0_4 = arith.constant 0 : index
    %3 = vector.load %arg3[%c0_3, %c0_4] : memref<1x16xf32, #tpu.memory_space<vmem>>, vector<1x16xf32>
    %4 = vector.broadcast %3 : vector<1x16xf32> to vector<128x16xf32>
    %5 = arith.addf %2, %4 : vector<128x16xf32>
    %cst_5 = arith.constant 0.000000e+00 : f32
    %6 = vector.broadcast %cst_5 : f32 to vector<128x16xf32>
    %7 = arith.maximumf %5, %6 : vector<128x16xf32>
    %8 = arith.truncf %7 : vector<128x16xf32> to vector<128x16xbf16>
    %c0_6 = arith.constant 0 : index
    %c0_7 = arith.constant 0 : index
    %9 = vector.load %arg4[%c0_6, %c0_7] : memref<128x16xbf16, #tpu.memory_space<vmem>>, vector<128x16xbf16>
    tpu.vector_store %arg4[%c0_6, %c0_7], %8 {strides = array<i32>} : memref<128x16xbf16, #tpu.memory_space<vmem>>, vector<128x16xbf16>,
    return
  }
  func.func @transform_0(%arg0: i32) -> (i32, i32) {
    %c0_i32 = arith.constant 0 : i32
    %c0_i32_0 = arith.constant 0 : i32
    return %arg0, %c0_i32 : i32, i32
  }
  func.func @transform_1(%arg0: i32) -> (i32, i32) {
    %c0_i32 = arith.constant 0 : i32
    %c0_i32_0 = arith.constant 0 : i32
    %c0_i32_1 = arith.constant 0 : i32
    return %c0_i32, %c0_i32_0 : i32, i32
  }
  func.func @transform_2(%arg0: i32) -> (i32, i32) {
    %c0_i32 = arith.constant 0 : i32
    %c0_i32_0 = arith.constant 0 : i32
    %c0_i32_1 = arith.constant 0 : i32
    return %c0_i32, %c0_i32_0 : i32, i32
  }
  func.func @transform_3(%arg0: i32) -> (i32, i32) {
    %c0_i32 = arith.constant 0 : i32
    %c0_i32_0 = arith.constant 0 : i32
    return %arg0, %c0_i32 : i32, i32
  }
}

module attributes {stable_mosaic.version = 11 : i64} {
  func.func @_conv2_residual_stack_kernel(%arg0: i32, %arg1: memref<32x256xbf16, #tpu.memory_space<vmem>>, %arg2: memref<256x32xbf16, #tpu.memory_space<vmem>>, %arg3: memref<1x32xf32, #tpu.memory_space<vmem>>, %arg4: memref<9x32x32xbf16, #tpu.memory_space<vmem>>, %arg5: memref<2x9x32x8xbf16, #tpu.memory_space<vmem>>, %arg6: memref<2x8x32xf32, #tpu.memory_space<vmem>>, %arg7: memref<32x32xf32, #tpu.memory_space<vmem>>) attributes {dimension_semantics = [#tpu.dimension_semantics<arbitrary>], iteration_bounds = array<i64: 1>, scalar_prefetch = 0 : i64, scratch_operands = 0 : i64, tpu.core_type = #tpu.core_type<tc>, window_params = [{pipeline_mode = #tpu.pipeline_mode<synchronous>, transform_indices = @transform_0, window_bounds = array<i64: 32, 256>}, {pipeline_mode = #tpu.pipeline_mode<synchronous>, transform_indices = @transform_1, window_bounds = array<i64: 256, 32>}, {pipeline_mode = #tpu.pipeline_mode<synchronous>, transform_indices = @transform_2, window_bounds = array<i64: 1, 32>}, {pipeline_mode = #tpu.pipeline_mode<synchronous>, transform_indices = @transform_3, window_bounds = array<i64: 9, 32, 32>}, {pipeline_mode = #tpu.pipeline_mode<synchronous>, transform_indices = @transform_4, window_bounds = array<i64: 2, 9, 32, 8>}, {pipeline_mode = #tpu.pipeline_mode<synchronous>, transform_indices = @transform_5, window_bounds = array<i64: 2, 8, 32>}, {pipeline_mode = #tpu.pipeline_mode<synchronous>, transform_indices = @transform_6, window_bounds = array<i64: 32, 32>}]} {
    %c0 = arith.constant 0 : index
    %c0_0 = arith.constant 0 : index
    %0 = vector.load %arg1[%c0, %c0_0] : memref<32x256xbf16, #tpu.memory_space<vmem>>, vector<32x256xbf16>
    %c0_1 = arith.constant 0 : index
    %c0_2 = arith.constant 0 : index
    %1 = vector.load %arg2[%c0_1, %c0_2] : memref<256x32xbf16, #tpu.memory_space<vmem>>, vector<256x32xbf16>
    %cst = arith.constant dense<0.000000e+00> : vector<32x32xf32>
    %2 = tpu.matmul %0, %1, %cst {dimension_numbers = #tpu.dot_dimension_numbers<[1], [0], [0], [1], [0, 0, 1, 1], [], []>} : vector<32x256xbf16>, vector<256x32xbf16>, vector<32x32xf32> -> vector<32x32xf32>
    %c0_3 = arith.constant 0 : index
    %c0_4 = arith.constant 0 : index
    %3 = vector.load %arg3[%c0_3, %c0_4] : memref<1x32xf32, #tpu.memory_space<vmem>>, vector<1x32xf32>
    %4 = vector.broadcast %3 : vector<1x32xf32> to vector<32x32xf32>
    %5 = arith.addf %2, %4 : vector<32x32xf32>
    %cst_5 = arith.constant 0.000000e+00 : f32
    %6 = vector.broadcast %cst_5 : f32 to vector<32x32xf32>
    %7 = arith.maximumf %5, %6 : vector<32x32xf32>
    %8 = arith.truncf %7 : vector<32x32xf32> to vector<32x32xbf16>
    %c0_6 = arith.constant 0 : index
    %c0_7 = arith.constant 0 : index
    %c0_8 = arith.constant 0 : index
    %9 = vector.load %arg4[%c0_6, %c0_7, %c0_8] : memref<9x32x32xbf16, #tpu.memory_space<vmem>>, vector<1x32x32xbf16>
    %10 = vector.shape_cast %9 : vector<1x32x32xbf16> to vector<32x32xbf16>
    %cst_9 = arith.constant dense<0.000000e+00> : vector<32x32xf32>
    %11 = tpu.matmul %10, %8, %cst_9 {dimension_numbers = #tpu.dot_dimension_numbers<[1], [0], [0], [1], [0, 0, 1, 1], [], []>} : vector<32x32xbf16>, vector<32x32xbf16>, vector<32x32xf32> -> vector<32x32xf32>
    %12 = arith.truncf %11 : vector<32x32xf32> to vector<32x32xbf16>
    %c0_10 = arith.constant 0 : index
    %c0_11 = arith.constant 0 : index
    %c0_12 = arith.constant 0 : index
    %c0_13 = arith.constant 0 : index
    %13 = vector.load %arg5[%c0_10, %c0_11, %c0_12, %c0_13] : memref<2x9x32x8xbf16, #tpu.memory_space<vmem>>, vector<1x1x32x8xbf16>
    %14 = vector.shape_cast %13 : vector<1x1x32x8xbf16> to vector<32x8xbf16>
    %cst_14 = arith.constant dense<0.000000e+00> : vector<32x8xf32>
    %15 = tpu.matmul %12, %14, %cst_14 {dimension_numbers = #tpu.dot_dimension_numbers<[1], [0], [0], [1], [0, 0, 1, 1], [], []>} : vector<32x32xbf16>, vector<32x8xbf16>, vector<32x8xf32> -> vector<32x8xf32>
    %c1 = arith.constant 1 : index
    %c0_15 = arith.constant 0 : index
    %c0_16 = arith.constant 0 : index
    %16 = vector.load %arg4[%c1, %c0_15, %c0_16] : memref<9x32x32xbf16, #tpu.memory_space<vmem>>, vector<1x32x32xbf16>
    %17 = vector.shape_cast %16 : vector<1x32x32xbf16> to vector<32x32xbf16>
    %cst_17 = arith.constant dense<0.000000e+00> : vector<32x32xf32>
    %18 = tpu.matmul %17, %8, %cst_17 {dimension_numbers = #tpu.dot_dimension_numbers<[1], [0], [0], [1], [0, 0, 1, 1], [], []>} : vector<32x32xbf16>, vector<32x32xbf16>, vector<32x32xf32> -> vector<32x32xf32>
    %19 = arith.truncf %18 : vector<32x32xf32> to vector<32x32xbf16>
    %c0_18 = arith.constant 0 : index
    %c1_19 = arith.constant 1 : index
    %c0_20 = arith.constant 0 : index
    %c0_21 = arith.constant 0 : index
    %20 = vector.load %arg5[%c0_18, %c1_19, %c0_20, %c0_21] : memref<2x9x32x8xbf16, #tpu.memory_space<vmem>>, vector<1x1x32x8xbf16>
    %21 = vector.shape_cast %20 : vector<1x1x32x8xbf16> to vector<32x8xbf16>
    %cst_22 = arith.constant dense<0.000000e+00> : vector<32x8xf32>
    %22 = tpu.matmul %19, %21, %cst_22 {dimension_numbers = #tpu.dot_dimension_numbers<[1], [0], [0], [1], [0, 0, 1, 1], [], []>} : vector<32x32xbf16>, vector<32x8xbf16>, vector<32x8xf32> -> vector<32x8xf32>
    %23 = arith.addf %15, %22 : vector<32x8xf32>
    %c2 = arith.constant 2 : index
    %c0_23 = arith.constant 0 : index
    %c0_24 = arith.constant 0 : index
    %24 = vector.load %arg4[%c2, %c0_23, %c0_24] : memref<9x32x32xbf16, #tpu.memory_space<vmem>>, vector<1x32x32xbf16>
    %25 = vector.shape_cast %24 : vector<1x32x32xbf16> to vector<32x32xbf16>
    %cst_25 = arith.constant dense<0.000000e+00> : vector<32x32xf32>
    %26 = tpu.matmul %25, %8, %cst_25 {dimension_numbers = #tpu.dot_dimension_numbers<[1], [0], [0], [1], [0, 0, 1, 1], [], []>} : vector<32x32xbf16>, vector<32x32xbf16>, vector<32x32xf32> -> vector<32x32xf32>
    %27 = arith.truncf %26 : vector<32x32xf32> to vector<32x32xbf16>
    %c0_26 = arith.constant 0 : index
    %c2_27 = arith.constant 2 : index
    %c0_28 = arith.constant 0 : index
    %c0_29 = arith.constant 0 : index
    %28 = vector.load %arg5[%c0_26, %c2_27, %c0_28, %c0_29] : memref<2x9x32x8xbf16, #tpu.memory_space<vmem>>, vector<1x1x32x8xbf16>
    %29 = vector.shape_cast %28 : vector<1x1x32x8xbf16> to vector<32x8xbf16>
    %cst_30 = arith.constant dense<0.000000e+00> : vector<32x8xf32>
    %30 = tpu.matmul %27, %29, %cst_30 {dimension_numbers = #tpu.dot_dimension_numbers<[1], [0], [0], [1], [0, 0, 1, 1], [], []>} : vector<32x32xbf16>, vector<32x8xbf16>, vector<32x8xf32> -> vector<32x8xf32>
    %31 = arith.addf %23, %30 : vector<32x8xf32>
    %c3 = arith.constant 3 : index
    %c0_31 = arith.constant 0 : index
    %c0_32 = arith.constant 0 : index
    %32 = vector.load %arg4[%c3, %c0_31, %c0_32] : memref<9x32x32xbf16, #tpu.memory_space<vmem>>, vector<1x32x32xbf16>
    %33 = vector.shape_cast %32 : vector<1x32x32xbf16> to vector<32x32xbf16>
    %cst_33 = arith.constant dense<0.000000e+00> : vector<32x32xf32>
    %34 = tpu.matmul %33, %8, %cst_33 {dimension_numbers = #tpu.dot_dimension_numbers<[1], [0], [0], [1], [0, 0, 1, 1], [], []>} : vector<32x32xbf16>, vector<32x32xbf16>, vector<32x32xf32> -> vector<32x32xf32>
    %35 = arith.truncf %34 : vector<32x32xf32> to vector<32x32xbf16>
    %c0_34 = arith.constant 0 : index
    %c3_35 = arith.constant 3 : index
    %c0_36 = arith.constant 0 : index
    %c0_37 = arith.constant 0 : index
    %36 = vector.load %arg5[%c0_34, %c3_35, %c0_36, %c0_37] : memref<2x9x32x8xbf16, #tpu.memory_space<vmem>>, vector<1x1x32x8xbf16>
    %37 = vector.shape_cast %36 : vector<1x1x32x8xbf16> to vector<32x8xbf16>
    %cst_38 = arith.constant dense<0.000000e+00> : vector<32x8xf32>
    %38 = tpu.matmul %35, %37, %cst_38 {dimension_numbers = #tpu.dot_dimension_numbers<[1], [0], [0], [1], [0, 0, 1, 1], [], []>} : vector<32x32xbf16>, vector<32x8xbf16>, vector<32x8xf32> -> vector<32x8xf32>
    %39 = arith.addf %31, %38 : vector<32x8xf32>
    %c4 = arith.constant 4 : index
    %c0_39 = arith.constant 0 : index
    %c0_40 = arith.constant 0 : index
    %40 = vector.load %arg4[%c4, %c0_39, %c0_40] : memref<9x32x32xbf16, #tpu.memory_space<vmem>>, vector<1x32x32xbf16>
    %41 = vector.shape_cast %40 : vector<1x32x32xbf16> to vector<32x32xbf16>
    %cst_41 = arith.constant dense<0.000000e+00> : vector<32x32xf32>
    %42 = tpu.matmul %41, %8, %cst_41 {dimension_numbers = #tpu.dot_dimension_numbers<[1], [0], [0], [1], [0, 0, 1, 1], [], []>} : vector<32x32xbf16>, vector<32x32xbf16>, vector<32x32xf32> -> vector<32x32xf32>
    %43 = arith.truncf %42 : vector<32x32xf32> to vector<32x32xbf16>
    %c0_42 = arith.constant 0 : index
    %c4_43 = arith.constant 4 : index
    %c0_44 = arith.constant 0 : index
    %c0_45 = arith.constant 0 : index
    %44 = vector.load %arg5[%c0_42, %c4_43, %c0_44, %c0_45] : memref<2x9x32x8xbf16, #tpu.memory_space<vmem>>, vector<1x1x32x8xbf16>
    %45 = vector.shape_cast %44 : vector<1x1x32x8xbf16> to vector<32x8xbf16>
    %cst_46 = arith.constant dense<0.000000e+00> : vector<32x8xf32>
    %46 = tpu.matmul %43, %45, %cst_46 {dimension_numbers = #tpu.dot_dimension_numbers<[1], [0], [0], [1], [0, 0, 1, 1], [], []>} : vector<32x32xbf16>, vector<32x8xbf16>, vector<32x8xf32> -> vector<32x8xf32>
    %47 = arith.addf %39, %46 : vector<32x8xf32>
    %c5 = arith.constant 5 : index
    %c0_47 = arith.constant 0 : index
    %c0_48 = arith.constant 0 : index
    %48 = vector.load %arg4[%c5, %c0_47, %c0_48] : memref<9x32x32xbf16, #tpu.memory_space<vmem>>, vector<1x32x32xbf16>
    %49 = vector.shape_cast %48 : vector<1x32x32xbf16> to vector<32x32xbf16>
    %cst_49 = arith.constant dense<0.000000e+00> : vector<32x32xf32>
    %50 = tpu.matmul %49, %8, %cst_49 {dimension_numbers = #tpu.dot_dimension_numbers<[1], [0], [0], [1], [0, 0, 1, 1], [], []>} : vector<32x32xbf16>, vector<32x32xbf16>, vector<32x32xf32> -> vector<32x32xf32>
    %51 = arith.truncf %50 : vector<32x32xf32> to vector<32x32xbf16>
    %c0_50 = arith.constant 0 : index
    %c5_51 = arith.constant 5 : index
    %c0_52 = arith.constant 0 : index
    %c0_53 = arith.constant 0 : index
    %52 = vector.load %arg5[%c0_50, %c5_51, %c0_52, %c0_53] : memref<2x9x32x8xbf16, #tpu.memory_space<vmem>>, vector<1x1x32x8xbf16>
    %53 = vector.shape_cast %52 : vector<1x1x32x8xbf16> to vector<32x8xbf16>
    %cst_54 = arith.constant dense<0.000000e+00> : vector<32x8xf32>
    %54 = tpu.matmul %51, %53, %cst_54 {dimension_numbers = #tpu.dot_dimension_numbers<[1], [0], [0], [1], [0, 0, 1, 1], [], []>} : vector<32x32xbf16>, vector<32x8xbf16>, vector<32x8xf32> -> vector<32x8xf32>
    %55 = arith.addf %47, %54 : vector<32x8xf32>
    %c6 = arith.constant 6 : index
    %c0_55 = arith.constant 0 : index
    %c0_56 = arith.constant 0 : index
    %56 = vector.load %arg4[%c6, %c0_55, %c0_56] : memref<9x32x32xbf16, #tpu.memory_space<vmem>>, vector<1x32x32xbf16>
    %57 = vector.shape_cast %56 : vector<1x32x32xbf16> to vector<32x32xbf16>
    %cst_57 = arith.constant dense<0.000000e+00> : vector<32x32xf32>
    %58 = tpu.matmul %57, %8, %cst_57 {dimension_numbers = #tpu.dot_dimension_numbers<[1], [0], [0], [1], [0, 0, 1, 1], [], []>} : vector<32x32xbf16>, vector<32x32xbf16>, vector<32x32xf32> -> vector<32x32xf32>
    %59 = arith.truncf %58 : vector<32x32xf32> to vector<32x32xbf16>
    %c0_58 = arith.constant 0 : index
    %c6_59 = arith.constant 6 : index
    %c0_60 = arith.constant 0 : index
    %c0_61 = arith.constant 0 : index
    %60 = vector.load %arg5[%c0_58, %c6_59, %c0_60, %c0_61] : memref<2x9x32x8xbf16, #tpu.memory_space<vmem>>, vector<1x1x32x8xbf16>
    %61 = vector.shape_cast %60 : vector<1x1x32x8xbf16> to vector<32x8xbf16>
    %cst_62 = arith.constant dense<0.000000e+00> : vector<32x8xf32>
    %62 = tpu.matmul %59, %61, %cst_62 {dimension_numbers = #tpu.dot_dimension_numbers<[1], [0], [0], [1], [0, 0, 1, 1], [], []>} : vector<32x32xbf16>, vector<32x8xbf16>, vector<32x8xf32> -> vector<32x8xf32>
    %63 = arith.addf %55, %62 : vector<32x8xf32>
    %c7 = arith.constant 7 : index
    %c0_63 = arith.constant 0 : index
    %c0_64 = arith.constant 0 : index
    %64 = vector.load %arg4[%c7, %c0_63, %c0_64] : memref<9x32x32xbf16, #tpu.memory_space<vmem>>, vector<1x32x32xbf16>
    %65 = vector.shape_cast %64 : vector<1x32x32xbf16> to vector<32x32xbf16>
    %cst_65 = arith.constant dense<0.000000e+00> : vector<32x32xf32>
    %66 = tpu.matmul %65, %8, %cst_65 {dimension_numbers = #tpu.dot_dimension_numbers<[1], [0], [0], [1], [0, 0, 1, 1], [], []>} : vector<32x32xbf16>, vector<32x32xbf16>, vector<32x32xf32> -> vector<32x32xf32>
    %67 = arith.truncf %66 : vector<32x32xf32> to vector<32x32xbf16>
    %c0_66 = arith.constant 0 : index
    %c7_67 = arith.constant 7 : index
    %c0_68 = arith.constant 0 : index
    %c0_69 = arith.constant 0 : index
    %68 = vector.load %arg5[%c0_66, %c7_67, %c0_68, %c0_69] : memref<2x9x32x8xbf16, #tpu.memory_space<vmem>>, vector<1x1x32x8xbf16>
    %69 = vector.shape_cast %68 : vector<1x1x32x8xbf16> to vector<32x8xbf16>
    %cst_70 = arith.constant dense<0.000000e+00> : vector<32x8xf32>
    %70 = tpu.matmul %67, %69, %cst_70 {dimension_numbers = #tpu.dot_dimension_numbers<[1], [0], [0], [1], [0, 0, 1, 1], [], []>} : vector<32x32xbf16>, vector<32x8xbf16>, vector<32x8xf32> -> vector<32x8xf32>
    %71 = arith.addf %63, %70 : vector<32x8xf32>
    %c8 = arith.constant 8 : index
    %c0_71 = arith.constant 0 : index
    %c0_72 = arith.constant 0 : index
    %72 = vector.load %arg4[%c8, %c0_71, %c0_72] : memref<9x32x32xbf16, #tpu.memory_space<vmem>>, vector<1x32x32xbf16>
    %73 = vector.shape_cast %72 : vector<1x32x32xbf16> to vector<32x32xbf16>
    %cst_73 = arith.constant dense<0.000000e+00> : vector<32x32xf32>
    %74 = tpu.matmul %73, %8, %cst_73 {dimension_numbers = #tpu.dot_dimension_numbers<[1], [0], [0], [1], [0, 0, 1, 1], [], []>} : vector<32x32xbf16>, vector<32x32xbf16>, vector<32x32xf32> -> vector<32x32xf32>
    %75 = arith.truncf %74 : vector<32x32xf32> to vector<32x32xbf16>
    %c0_74 = arith.constant 0 : index
    %c8_75 = arith.constant 8 : index
    %c0_76 = arith.constant 0 : index
    %c0_77 = arith.constant 0 : index
    %76 = vector.load %arg5[%c0_74, %c8_75, %c0_76, %c0_77] : memref<2x9x32x8xbf16, #tpu.memory_space<vmem>>, vector<1x1x32x8xbf16>
    %77 = vector.shape_cast %76 : vector<1x1x32x8xbf16> to vector<32x8xbf16>
    %cst_78 = arith.constant dense<0.000000e+00> : vector<32x8xf32>
    %78 = tpu.matmul %75, %77, %cst_78 {dimension_numbers = #tpu.dot_dimension_numbers<[1], [0], [0], [1], [0, 0, 1, 1], [], []>} : vector<32x32xbf16>, vector<32x8xbf16>, vector<32x8xf32> -> vector<32x8xf32>
    %79 = arith.addf %71, %78 : vector<32x8xf32>
    %cst_79 = arith.constant 0.000000e+00 : f32
    %80 = vector.broadcast %cst_79 : f32 to vector<32x8xf32>
    %81 = arith.maximumf %79, %80 : vector<32x8xf32>
    %c0_80 = arith.constant 0 : index
    %c0_81 = arith.constant 0 : index
    %c0_82 = arith.constant 0 : index
    %82 = vector.load %arg6[%c0_80, %c0_81, %c0_82] : memref<2x8x32xf32, #tpu.memory_space<vmem>>, vector<1x8x32xf32>
    %83 = vector.shape_cast %82 : vector<1x8x32xf32> to vector<8x32xf32>
    %cst_83 = arith.constant dense<0.000000e+00> : vector<32x32xf32>
    %84 = tpu.matmul %81, %83, %cst_83 {dimension_numbers = #tpu.dot_dimension_numbers<[1], [0], [0], [1], [0, 0, 1, 1], [], []>} : vector<32x8xf32>, vector<8x32xf32>, vector<32x32xf32> -> vector<32x32xf32>
    %85 = arith.addf %5, %84 : vector<32x32xf32>
    %cst_84 = arith.constant 0.000000e+00 : f32
    %86 = vector.broadcast %cst_84 : f32 to vector<32x32xf32>
    %87 = arith.maximumf %85, %86 : vector<32x32xf32>
    %88 = arith.truncf %87 : vector<32x32xf32> to vector<32x32xbf16>
    %c0_85 = arith.constant 0 : index
    %c0_86 = arith.constant 0 : index
    %c0_87 = arith.constant 0 : index
    %89 = vector.load %arg4[%c0_85, %c0_86, %c0_87] : memref<9x32x32xbf16, #tpu.memory_space<vmem>>, vector<1x32x32xbf16>
    %90 = vector.shape_cast %89 : vector<1x32x32xbf16> to vector<32x32xbf16>
    %cst_88 = arith.constant dense<0.000000e+00> : vector<32x32xf32>
    %91 = tpu.matmul %90, %88, %cst_88 {dimension_numbers = #tpu.dot_dimension_numbers<[1], [0], [0], [1], [0, 0, 1, 1], [], []>} : vector<32x32xbf16>, vector<32x32xbf16>, vector<32x32xf32> -> vector<32x32xf32>
    %92 = arith.truncf %91 : vector<32x32xf32> to vector<32x32xbf16>
    %c1_89 = arith.constant 1 : index
    %c0_90 = arith.constant 0 : index
    %c0_91 = arith.constant 0 : index
    %c0_92 = arith.constant 0 : index
    %93 = vector.load %arg5[%c1_89, %c0_90, %c0_91, %c0_92] : memref<2x9x32x8xbf16, #tpu.memory_space<vmem>>, vector<1x1x32x8xbf16>
    %94 = vector.shape_cast %93 : vector<1x1x32x8xbf16> to vector<32x8xbf16>
    %cst_93 = arith.constant dense<0.000000e+00> : vector<32x8xf32>
    %95 = tpu.matmul %92, %94, %cst_93 {dimension_numbers = #tpu.dot_dimension_numbers<[1], [0], [0], [1], [0, 0, 1, 1], [], []>} : vector<32x32xbf16>, vector<32x8xbf16>, vector<32x8xf32> -> vector<32x8xf32>
    %c1_94 = arith.constant 1 : index
    %c0_95 = arith.constant 0 : index
    %c0_96 = arith.constant 0 : index
    %96 = vector.load %arg4[%c1_94, %c0_95, %c0_96] : memref<9x32x32xbf16, #tpu.memory_space<vmem>>, vector<1x32x32xbf16>
    %97 = vector.shape_cast %96 : vector<1x32x32xbf16> to vector<32x32xbf16>
    %cst_97 = arith.constant dense<0.000000e+00> : vector<32x32xf32>
    %98 = tpu.matmul %97, %88, %cst_97 {dimension_numbers = #tpu.dot_dimension_numbers<[1], [0], [0], [1], [0, 0, 1, 1], [], []>} : vector<32x32xbf16>, vector<32x32xbf16>, vector<32x32xf32> -> vector<32x32xf32>
    %99 = arith.truncf %98 : vector<32x32xf32> to vector<32x32xbf16>
    %c1_98 = arith.constant 1 : index
    %c1_99 = arith.constant 1 : index
    %c0_100 = arith.constant 0 : index
    %c0_101 = arith.constant 0 : index
    %100 = vector.load %arg5[%c1_98, %c1_99, %c0_100, %c0_101] : memref<2x9x32x8xbf16, #tpu.memory_space<vmem>>, vector<1x1x32x8xbf16>
    %101 = vector.shape_cast %100 : vector<1x1x32x8xbf16> to vector<32x8xbf16>
    %cst_102 = arith.constant dense<0.000000e+00> : vector<32x8xf32>
    %102 = tpu.matmul %99, %101, %cst_102 {dimension_numbers = #tpu.dot_dimension_numbers<[1], [0], [0], [1], [0, 0, 1, 1], [], []>} : vector<32x32xbf16>, vector<32x8xbf16>, vector<32x8xf32> -> vector<32x8xf32>
    %103 = arith.addf %95, %102 : vector<32x8xf32>
    %c2_103 = arith.constant 2 : index
    %c0_104 = arith.constant 0 : index
    %c0_105 = arith.constant 0 : index
    %104 = vector.load %arg4[%c2_103, %c0_104, %c0_105] : memref<9x32x32xbf16, #tpu.memory_space<vmem>>, vector<1x32x32xbf16>
    %105 = vector.shape_cast %104 : vector<1x32x32xbf16> to vector<32x32xbf16>
    %cst_106 = arith.constant dense<0.000000e+00> : vector<32x32xf32>
    %106 = tpu.matmul %105, %88, %cst_106 {dimension_numbers = #tpu.dot_dimension_numbers<[1], [0], [0], [1], [0, 0, 1, 1], [], []>} : vector<32x32xbf16>, vector<32x32xbf16>, vector<32x32xf32> -> vector<32x32xf32>
    %107 = arith.truncf %106 : vector<32x32xf32> to vector<32x32xbf16>
    %c1_107 = arith.constant 1 : index
    %c2_108 = arith.constant 2 : index
    %c0_109 = arith.constant 0 : index
    %c0_110 = arith.constant 0 : index
    %108 = vector.load %arg5[%c1_107, %c2_108, %c0_109, %c0_110] : memref<2x9x32x8xbf16, #tpu.memory_space<vmem>>, vector<1x1x32x8xbf16>
    %109 = vector.shape_cast %108 : vector<1x1x32x8xbf16> to vector<32x8xbf16>
    %cst_111 = arith.constant dense<0.000000e+00> : vector<32x8xf32>
    %110 = tpu.matmul %107, %109, %cst_111 {dimension_numbers = #tpu.dot_dimension_numbers<[1], [0], [0], [1], [0, 0, 1, 1], [], []>} : vector<32x32xbf16>, vector<32x8xbf16>, vector<32x8xf32> -> vector<32x8xf32>
    %111 = arith.addf %103, %110 : vector<32x8xf32>
    %c3_112 = arith.constant 3 : index
    %c0_113 = arith.constant 0 : index
    %c0_114 = arith.constant 0 : index
    %112 = vector.load %arg4[%c3_112, %c0_113, %c0_114] : memref<9x32x32xbf16, #tpu.memory_space<vmem>>, vector<1x32x32xbf16>
    %113 = vector.shape_cast %112 : vector<1x32x32xbf16> to vector<32x32xbf16>
    %cst_115 = arith.constant dense<0.000000e+00> : vector<32x32xf32>
    %114 = tpu.matmul %113, %88, %cst_115 {dimension_numbers = #tpu.dot_dimension_numbers<[1], [0], [0], [1], [0, 0, 1, 1], [], []>} : vector<32x32xbf16>, vector<32x32xbf16>, vector<32x32xf32> -> vector<32x32xf32>
    %115 = arith.truncf %114 : vector<32x32xf32> to vector<32x32xbf16>
    %c1_116 = arith.constant 1 : index
    %c3_117 = arith.constant 3 : index
    %c0_118 = arith.constant 0 : index
    %c0_119 = arith.constant 0 : index
    %116 = vector.load %arg5[%c1_116, %c3_117, %c0_118, %c0_119] : memref<2x9x32x8xbf16, #tpu.memory_space<vmem>>, vector<1x1x32x8xbf16>
    %117 = vector.shape_cast %116 : vector<1x1x32x8xbf16> to vector<32x8xbf16>
    %cst_120 = arith.constant dense<0.000000e+00> : vector<32x8xf32>
    %118 = tpu.matmul %115, %117, %cst_120 {dimension_numbers = #tpu.dot_dimension_numbers<[1], [0], [0], [1], [0, 0, 1, 1], [], []>} : vector<32x32xbf16>, vector<32x8xbf16>, vector<32x8xf32> -> vector<32x8xf32>
    %119 = arith.addf %111, %118 : vector<32x8xf32>
    %c4_121 = arith.constant 4 : index
    %c0_122 = arith.constant 0 : index
    %c0_123 = arith.constant 0 : index
    %120 = vector.load %arg4[%c4_121, %c0_122, %c0_123] : memref<9x32x32xbf16, #tpu.memory_space<vmem>>, vector<1x32x32xbf16>
    %121 = vector.shape_cast %120 : vector<1x32x32xbf16> to vector<32x32xbf16>
    %cst_124 = arith.constant dense<0.000000e+00> : vector<32x32xf32>
    %122 = tpu.matmul %121, %88, %cst_124 {dimension_numbers = #tpu.dot_dimension_numbers<[1], [0], [0], [1], [0, 0, 1, 1], [], []>} : vector<32x32xbf16>, vector<32x32xbf16>, vector<32x32xf32> -> vector<32x32xf32>
    %123 = arith.truncf %122 : vector<32x32xf32> to vector<32x32xbf16>
    %c1_125 = arith.constant 1 : index
    %c4_126 = arith.constant 4 : index
    %c0_127 = arith.constant 0 : index
    %c0_128 = arith.constant 0 : index
    %124 = vector.load %arg5[%c1_125, %c4_126, %c0_127, %c0_128] : memref<2x9x32x8xbf16, #tpu.memory_space<vmem>>, vector<1x1x32x8xbf16>
    %125 = vector.shape_cast %124 : vector<1x1x32x8xbf16> to vector<32x8xbf16>
    %cst_129 = arith.constant dense<0.000000e+00> : vector<32x8xf32>
    %126 = tpu.matmul %123, %125, %cst_129 {dimension_numbers = #tpu.dot_dimension_numbers<[1], [0], [0], [1], [0, 0, 1, 1], [], []>} : vector<32x32xbf16>, vector<32x8xbf16>, vector<32x8xf32> -> vector<32x8xf32>
    %127 = arith.addf %119, %126 : vector<32x8xf32>
    %c5_130 = arith.constant 5 : index
    %c0_131 = arith.constant 0 : index
    %c0_132 = arith.constant 0 : index
    %128 = vector.load %arg4[%c5_130, %c0_131, %c0_132] : memref<9x32x32xbf16, #tpu.memory_space<vmem>>, vector<1x32x32xbf16>
    %129 = vector.shape_cast %128 : vector<1x32x32xbf16> to vector<32x32xbf16>
    %cst_133 = arith.constant dense<0.000000e+00> : vector<32x32xf32>
    %130 = tpu.matmul %129, %88, %cst_133 {dimension_numbers = #tpu.dot_dimension_numbers<[1], [0], [0], [1], [0, 0, 1, 1], [], []>} : vector<32x32xbf16>, vector<32x32xbf16>, vector<32x32xf32> -> vector<32x32xf32>
    %131 = arith.truncf %130 : vector<32x32xf32> to vector<32x32xbf16>
    %c1_134 = arith.constant 1 : index
    %c5_135 = arith.constant 5 : index
    %c0_136 = arith.constant 0 : index
    %c0_137 = arith.constant 0 : index
    %132 = vector.load %arg5[%c1_134, %c5_135, %c0_136, %c0_137] : memref<2x9x32x8xbf16, #tpu.memory_space<vmem>>, vector<1x1x32x8xbf16>
    %133 = vector.shape_cast %132 : vector<1x1x32x8xbf16> to vector<32x8xbf16>
    %cst_138 = arith.constant dense<0.000000e+00> : vector<32x8xf32>
    %134 = tpu.matmul %131, %133, %cst_138 {dimension_numbers = #tpu.dot_dimension_numbers<[1], [0], [0], [1], [0, 0, 1, 1], [], []>} : vector<32x32xbf16>, vector<32x8xbf16>, vector<32x8xf32> -> vector<32x8xf32>
    %135 = arith.addf %127, %134 : vector<32x8xf32>
    %c6_139 = arith.constant 6 : index
    %c0_140 = arith.constant 0 : index
    %c0_141 = arith.constant 0 : index
    %136 = vector.load %arg4[%c6_139, %c0_140, %c0_141] : memref<9x32x32xbf16, #tpu.memory_space<vmem>>, vector<1x32x32xbf16>
    %137 = vector.shape_cast %136 : vector<1x32x32xbf16> to vector<32x32xbf16>
    %cst_142 = arith.constant dense<0.000000e+00> : vector<32x32xf32>
    %138 = tpu.matmul %137, %88, %cst_142 {dimension_numbers = #tpu.dot_dimension_numbers<[1], [0], [0], [1], [0, 0, 1, 1], [], []>} : vector<32x32xbf16>, vector<32x32xbf16>, vector<32x32xf32> -> vector<32x32xf32>
    %139 = arith.truncf %138 : vector<32x32xf32> to vector<32x32xbf16>
    %c1_143 = arith.constant 1 : index
    %c6_144 = arith.constant 6 : index
    %c0_145 = arith.constant 0 : index
    %c0_146 = arith.constant 0 : index
    %140 = vector.load %arg5[%c1_143, %c6_144, %c0_145, %c0_146] : memref<2x9x32x8xbf16, #tpu.memory_space<vmem>>, vector<1x1x32x8xbf16>
    %141 = vector.shape_cast %140 : vector<1x1x32x8xbf16> to vector<32x8xbf16>
    %cst_147 = arith.constant dense<0.000000e+00> : vector<32x8xf32>
    %142 = tpu.matmul %139, %141, %cst_147 {dimension_numbers = #tpu.dot_dimension_numbers<[1], [0], [0], [1], [0, 0, 1, 1], [], []>} : vector<32x32xbf16>, vector<32x8xbf16>, vector<32x8xf32> -> vector<32x8xf32>
    %143 = arith.addf %135, %142 : vector<32x8xf32>
    %c7_148 = arith.constant 7 : index
    %c0_149 = arith.constant 0 : index
    %c0_150 = arith.constant 0 : index
    %144 = vector.load %arg4[%c7_148, %c0_149, %c0_150] : memref<9x32x32xbf16, #tpu.memory_space<vmem>>, vector<1x32x32xbf16>
    %145 = vector.shape_cast %144 : vector<1x32x32xbf16> to vector<32x32xbf16>
    %cst_151 = arith.constant dense<0.000000e+00> : vector<32x32xf32>
    %146 = tpu.matmul %145, %88, %cst_151 {dimension_numbers = #tpu.dot_dimension_numbers<[1], [0], [0], [1], [0, 0, 1, 1], [], []>} : vector<32x32xbf16>, vector<32x32xbf16>, vector<32x32xf32> -> vector<32x32xf32>
    %147 = arith.truncf %146 : vector<32x32xf32> to vector<32x32xbf16>
    %c1_152 = arith.constant 1 : index
    %c7_153 = arith.constant 7 : index
    %c0_154 = arith.constant 0 : index
    %c0_155 = arith.constant 0 : index
    %148 = vector.load %arg5[%c1_152, %c7_153, %c0_154, %c0_155] : memref<2x9x32x8xbf16, #tpu.memory_space<vmem>>, vector<1x1x32x8xbf16>
    %149 = vector.shape_cast %148 : vector<1x1x32x8xbf16> to vector<32x8xbf16>
    %cst_156 = arith.constant dense<0.000000e+00> : vector<32x8xf32>
    %150 = tpu.matmul %147, %149, %cst_156 {dimension_numbers = #tpu.dot_dimension_numbers<[1], [0], [0], [1], [0, 0, 1, 1], [], []>} : vector<32x32xbf16>, vector<32x8xbf16>, vector<32x8xf32> -> vector<32x8xf32>
    %151 = arith.addf %143, %150 : vector<32x8xf32>
    %c8_157 = arith.constant 8 : index
    %c0_158 = arith.constant 0 : index
    %c0_159 = arith.constant 0 : index
    %152 = vector.load %arg4[%c8_157, %c0_158, %c0_159] : memref<9x32x32xbf16, #tpu.memory_space<vmem>>, vector<1x32x32xbf16>
    %153 = vector.shape_cast %152 : vector<1x32x32xbf16> to vector<32x32xbf16>
    %cst_160 = arith.constant dense<0.000000e+00> : vector<32x32xf32>
    %154 = tpu.matmul %153, %88, %cst_160 {dimension_numbers = #tpu.dot_dimension_numbers<[1], [0], [0], [1], [0, 0, 1, 1], [], []>} : vector<32x32xbf16>, vector<32x32xbf16>, vector<32x32xf32> -> vector<32x32xf32>
    %155 = arith.truncf %154 : vector<32x32xf32> to vector<32x32xbf16>
    %c1_161 = arith.constant 1 : index
    %c8_162 = arith.constant 8 : index
    %c0_163 = arith.constant 0 : index
    %c0_164 = arith.constant 0 : index
    %156 = vector.load %arg5[%c1_161, %c8_162, %c0_163, %c0_164] : memref<2x9x32x8xbf16, #tpu.memory_space<vmem>>, vector<1x1x32x8xbf16>
    %157 = vector.shape_cast %156 : vector<1x1x32x8xbf16> to vector<32x8xbf16>
    %cst_165 = arith.constant dense<0.000000e+00> : vector<32x8xf32>
    %158 = tpu.matmul %155, %157, %cst_165 {dimension_numbers = #tpu.dot_dimension_numbers<[1], [0], [0], [1], [0, 0, 1, 1], [], []>} : vector<32x32xbf16>, vector<32x8xbf16>, vector<32x8xf32> -> vector<32x8xf32>
    %159 = arith.addf %151, %158 : vector<32x8xf32>
    %cst_166 = arith.constant 0.000000e+00 : f32
    %160 = vector.broadcast %cst_166 : f32 to vector<32x8xf32>
    %161 = arith.maximumf %159, %160 : vector<32x8xf32>
    %c1_167 = arith.constant 1 : index
    %c0_168 = arith.constant 0 : index
    %c0_169 = arith.constant 0 : index
    %162 = vector.load %arg6[%c1_167, %c0_168, %c0_169] : memref<2x8x32xf32, #tpu.memory_space<vmem>>, vector<1x8x32xf32>
    %163 = vector.shape_cast %162 : vector<1x8x32xf32> to vector<8x32xf32>
    %cst_170 = arith.constant dense<0.000000e+00> : vector<32x32xf32>
    %164 = tpu.matmul %161, %163, %cst_170 {dimension_numbers = #tpu.dot_dimension_numbers<[1], [0], [0], [1], [0, 0, 1, 1], [], []>} : vector<32x8xf32>, vector<8x32xf32>, vector<32x32xf32> -> vector<32x32xf32>
    %165 = arith.addf %85, %164 : vector<32x32xf32>
    %cst_171 = arith.constant 0.000000e+00 : f32
    %166 = vector.broadcast %cst_171 : f32 to vector<32x32xf32>
    %167 = arith.maximumf %165, %166 : vector<32x32xf32>
    %c0_172 = arith.constant 0 : index
    %c0_173 = arith.constant 0 : index
    %168 = vector.load %arg7[%c0_172, %c0_173] : memref<32x32xf32, #tpu.memory_space<vmem>>, vector<32x32xf32>
    tpu.vector_store %arg7[%c0_172, %c0_173], %167 {strides = array<i32>} : memref<32x32xf32, #tpu.memory_space<vmem>>, vector<32x32xf32>,
    return
  }
  func.func @transform_0(%arg0: i32) -> (i32, i32) {
    %c0_i32 = arith.constant 0 : i32
    %c0_i32_0 = arith.constant 0 : i32
    %c0_i32_1 = arith.constant 0 : i32
    return %c0_i32, %c0_i32_0 : i32, i32
  }
  func.func @transform_1(%arg0: i32) -> (i32, i32) {
    %c0_i32 = arith.constant 0 : i32
    %c0_i32_0 = arith.constant 0 : i32
    %c0_i32_1 = arith.constant 0 : i32
    return %c0_i32, %c0_i32_0 : i32, i32
  }
  func.func @transform_2(%arg0: i32) -> (i32, i32) {
    %c0_i32 = arith.constant 0 : i32
    %c0_i32_0 = arith.constant 0 : i32
    %c0_i32_1 = arith.constant 0 : i32
    return %c0_i32, %c0_i32_0 : i32, i32
  }
  func.func @transform_3(%arg0: i32) -> (i32, i32, i32) {
    %c0_i32 = arith.constant 0 : i32
    %c0_i32_0 = arith.constant 0 : i32
    %c0_i32_1 = arith.constant 0 : i32
    %c0_i32_2 = arith.constant 0 : i32
    return %c0_i32, %c0_i32_0, %c0_i32_1 : i32, i32, i32
  }
  func.func @transform_4(%arg0: i32) -> (i32, i32, i32, i32) {
    %c0_i32 = arith.constant 0 : i32
    %c0_i32_0 = arith.constant 0 : i32
    %c0_i32_1 = arith.constant 0 : i32
    %c0_i32_2 = arith.constant 0 : i32
    %c0_i32_3 = arith.constant 0 : i32
    return %c0_i32, %c0_i32_0, %c0_i32_1, %c0_i32_2 : i32, i32, i32, i32
  }
  func.func @transform_5(%arg0: i32) -> (i32, i32, i32) {
    %c0_i32 = arith.constant 0 : i32
    %c0_i32_0 = arith.constant 0 : i32
    %c0_i32_1 = arith.constant 0 : i32
    %c0_i32_2 = arith.constant 0 : i32
    return %c0_i32, %c0_i32_0, %c0_i32_1 : i32, i32, i32
  }
  func.func @transform_6(%arg0: i32) -> (i32, i32) {
    %c0_i32 = arith.constant 0 : i32
    %c0_i32_0 = arith.constant 0 : i32
    %c0_i32_1 = arith.constant 0 : i32
    return %c0_i32, %c0_i32_0 : i32, i32
  }
}

</mosaic_0001>

<bundles_post_ra>
// kernel: _lambda_.2
= control target key start
LH: loop header
LB: loop body
LE: loop exit
PB: predicated region body
PF: predicated region fallthrough
CT: control target
= control target key end

     0   :  { %vm83_vm0 = vcmask 130048   ;;  %vm189_vm1 = vcmask 125952   ;;  %s407_s1 = inlined_call_operand.vmem [shape: bf16[16,16], index: 1, kind: input, shape index: {}]   ;;  %s408_s0 = inlined_call_operand.vmem [shape: bf16[128,16], index: 0, kind: input, shape index: {}]   ;;  %s409_s2 = inlined_call_operand.vmem [shape: f32[1,16], index: 2, kind: input, shape index: {}]   ;;  %s410_s3 = inlined_call_operand.vmem [shape: bf16[128,16], index: 3, kind: output, shape index: {}]  }
   0x1   :  { %v262_v0 = vld [vmem:[%s407_s1] sm:$0xff]  ;;  %v256_v2 = vld [vmem:[%s408_s0 + $0x10] sm:$0xff]  ;;  %v255_v5 = vld [vmem:[%s408_s0 + $0x8] sm:$0xff] }
   0x2   :  { %v254_v1 = vld [vmem:[%s408_s0] sm:$0xff]  ;;  %115 = vmatpush.bf16.msra.mxu0 %v262_v0  ;;  %263 = vmatpush.bf16.msra.mxu1 %v262_v0  ;;  %v260_v4 = vld [vmem:[%s408_s0 + $0x30] sm:$0xff]  ;;  %v257_v6 = vld [vmem:[%s408_s0 + $0x18] sm:$0xff] }
   0x3   :  { %v258_v3 = vld [vmem:[%s408_s0 + $0x20] sm:$0xff]  ;;  %264 = vmatpush.bf16.msra.mxu2 %v262_v0  ;;  %265 = vmatpush.bf16.msra.mxu3 %v262_v0  ;;  %v259_v7 = vld [vmem:[%s408_s0 + $0x28] sm:$0xff]  ;;  %v261_v8 = vld [vmem:[%s408_s0 + $0x38] sm:$0xff] }
   0x4   :  { %v325_v9 = vld [vmem:[%s409_s2] ss:$0 sm:$0xff] }
   0x5   :  { %246 = vmatmul.msk.bf16.vlgmr.msra.gmra.mxu0 %vm83_vm0, %v254_v1  ;;  %248 = vmatmul.msk.bf16.vlgmr.msra.gmra.mxu1 %vm83_vm0, %v256_v2 }
   0x6   :  { %250 = vmatmul.msk.bf16.vlgmr.msra.gmra.mxu2 %vm83_vm0, %v258_v3  ;;  %252 = vmatmul.msk.bf16.vlgmr.msra.gmra.mxu3 %vm83_vm0, %v260_v4 }
  0x15   :  { %247 = vmatmul.msk.bf16.gmra.mxu0 %vm83_vm0, %v255_v5  ;;  %249 = vmatmul.msk.bf16.gmra.mxu1 %vm83_vm0, %v257_v6 }
  0x16   :  { %251 = vmatmul.msk.bf16.gmra.mxu2 %vm83_vm0, %v259_v7  ;;  %253 = vmatmul.msk.bf16.gmra.mxu3 %vm83_vm0, %v261_v8 }
  0x82   :  { %v117_v10 = vpop.f32.mrf.mxu0  ;;  %v127_v11 = vpop.f32.mrf.mxu1 }
  0x83   :  { %v118_v12 = vadd.f32 %v325_v9, %v117_v10  ;;  %v128_v13 = vadd.f32 %v325_v9, %v127_v11 }
  0x85   :  { %v157_v14 = vmax.f32 %v118_v12, 0.0  ;;  %v161_v15 = vmax.f32 %v128_v13, 0.0 }
  0x87   :  { %v173_v16 = vpack.c.bf16 %v157_v14, %v157_v14  ;;  %v177_v17 = vpack.c.bf16 %v161_v15, %v161_v15 }
  0x89   :  { %190 = vst.msk [vmem:[%s410_s3] sm:$0xf] %vm189_vm1, %v173_v16  ;;  %v137_v18 = vpop.f32.mrf.mxu2  ;;  %v147_v19 = vpop.f32.mrf.mxu3 }
  0x8a   :  { %194 = vst.msk [vmem:[%s410_s3 + $0x10] sm:$0xf] %vm189_vm1, %v177_v17  ;;  %v138_v20 = vadd.f32 %v325_v9, %v137_v18  ;;  %v148_v21 = vadd.f32 %v325_v9, %v147_v19  ;;  %v119_v22 = vpop.f32.mrf.mxu0  ;;  %v129_v23 = vpop.f32.mrf.mxu1 }
  0x8b   :  { %v120_v24 = vadd.f32 %v325_v9, %v119_v22  ;;  %v130_v25 = vadd.f32 %v325_v9, %v129_v23 }
  0x8c   :  { %v165_v26 = vmax.f32 %v138_v20, 0.0  ;;  %v169_v27 = vmax.f32 %v148_v21, 0.0 }
  0x8d   :  { %v158_v28 = vmax.f32 %v120_v24, 0.0  ;;  %v162_v29 = vmax.f32 %v130_v25, 0.0 }
  0x8e   :  { %v181_v30 = vpack.c.bf16 %v165_v26, %v165_v26  ;;  %v185_v31 = vpack.c.bf16 %v169_v27, %v169_v27 }
  0x8f   :  { %v174_v32 = vpack.c.bf16 %v158_v28, %v158_v28  ;;  %v178_v33 = vpack.c.bf16 %v162_v29, %v162_v29 }
  0x90   :  { %198 = vst.msk [vmem:[%s410_s3 + $0x20] sm:$0xf] %vm189_vm1, %v181_v30 }
  0x91   :  { %202 = vst.msk [vmem:[%s410_s3 + $0x30] sm:$0xf] %vm189_vm1, %v185_v31  ;;  %v139_v34 = vpop.f32.mrf.mxu2  ;;  %v149_v35 = vpop.f32.mrf.mxu3 }
  0x92   :  { %191 = vst.msk [vmem:[%s410_s3 + $0x4] sm:$0xf] %vm189_vm1, %v174_v32  ;;  %v140_v36 = vadd.f32 %v325_v9, %v139_v34  ;;  %v150_v37 = vadd.f32 %v325_v9, %v149_v35  ;;  %v122_v38 = vpop.f32.mrf.mxu0  ;;  %v132_v39 = vpop.f32.mrf.mxu1 }
  0x93   :  { %195 = vst.msk [vmem:[%s410_s3 + $0x14] sm:$0xf] %vm189_vm1, %v178_v33  ;;  %v123_v40 = vadd.f32 %v325_v9, %v122_v38  ;;  %v133_v41 = vadd.f32 %v325_v9, %v132_v39 }
  0x94   :  { %v166_v42 = vmax.f32 %v140_v36, 0.0  ;;  %v170_v43 = vmax.f32 %v150_v37, 0.0 }
  0x95   :  { %v159_v44 = vmax.f32 %v123_v40, 0.0  ;;  %v163_v45 = vmax.f32 %v133_v41, 0.0 }
  0x96   :  { %v182_v46 = vpack.c.bf16 %v166_v42, %v166_v42  ;;  %v186_v47 = vpack.c.bf16 %v170_v43, %v170_v43 }
  0x97   :  { %v175_v48 = vpack.c.bf16 %v159_v44, %v159_v44  ;;  %v179_v49 = vpack.c.bf16 %v163_v45, %v163_v45 }
  0x98   :  { %199 = vst.msk [vmem:[%s410_s3 + $0x24] sm:$0xf] %vm189_vm1, %v182_v46 }
  0x99   :  { %203 = vst.msk [vmem:[%s410_s3 + $0x34] sm:$0xf] %vm189_vm1, %v186_v47  ;;  %v142_v50 = vpop.f32.mrf.mxu2  ;;  %v152_v51 = vpop.f32.mrf.mxu3 }
  0x9a   :  { %192 = vst.msk [vmem:[%s410_s3 + $0x8] sm:$0xf] %vm189_vm1, %v175_v48  ;;  %v143_v52 = vadd.f32 %v325_v9, %v142_v50  ;;  %v153_v53 = vadd.f32 %v325_v9, %v152_v51  ;;  %v124_v54 = vpop.f32.mrf.mxu0  ;;  %v134_v55 = vpop.f32.mrf.mxu1 }
  0x9b   :  { %196 = vst.msk [vmem:[%s410_s3 + $0x18] sm:$0xf] %vm189_vm1, %v179_v49  ;;  %v125_v56 = vadd.f32 %v325_v9, %v124_v54  ;;  %v135_v57 = vadd.f32 %v325_v9, %v134_v55 }
  0x9c   :  { %v167_v58 = vmax.f32 %v143_v52, 0.0  ;;  %v171_v59 = vmax.f32 %v153_v53, 0.0 }
  0x9d   :  { %v160_v60 = vmax.f32 %v125_v56, 0.0  ;;  %v164_v61 = vmax.f32 %v135_v57, 0.0 }
  0x9e   :  { %v183_v62 = vpack.c.bf16 %v167_v58, %v167_v58  ;;  %v187_v63 = vpack.c.bf16 %v171_v59, %v171_v59 }
  0x9f   :  { %v176_v0 = vpack.c.bf16 %v160_v60, %v160_v60  ;;  %v180_v1 = vpack.c.bf16 %v164_v61, %v164_v61 }
  0xa0   :  { %200 = vst.msk [vmem:[%s410_s3 + $0x28] sm:$0xf] %vm189_vm1, %v183_v62 }
  0xa1   :  { %204 = vst.msk [vmem:[%s410_s3 + $0x38] sm:$0xf] %vm189_vm1, %v187_v63  ;;  %v144_v2 = vpop.f32.mrf.mxu2  ;;  %v154_v3 = vpop.f32.mrf.mxu3 }
  0xa2   :  { %193 = vst.msk [vmem:[%s410_s3 + $0xc] sm:$0xf] %vm189_vm1, %v176_v0  ;;  %v145_v4 = vadd.f32 %v325_v9, %v144_v2  ;;  %v155_v5 = vadd.f32 %v325_v9, %v154_v3 }
  0xa3   :  { %197 = vst.msk [vmem:[%s410_s3 + $0x1c] sm:$0xf] %vm189_vm1, %v180_v1 }
  0xa4   :  { %v168_v6 = vmax.f32 %v145_v4, 0.0  ;;  %v172_v7 = vmax.f32 %v155_v5, 0.0 }
  0xa6   :  { %v184_v8 = vpack.c.bf16 %v168_v6, %v168_v6  ;;  %v188_v10 = vpack.c.bf16 %v172_v7, %v172_v7 }
  0xa8   :  { %201 = vst.msk [vmem:[%s410_s3 + $0x2c] sm:$0xf] %vm189_vm1, %v184_v8 }
  0xa9   :  { %205 = vst.msk [vmem:[%s410_s3 + $0x3c] sm:$0xf] %vm189_vm1, %v188_v10 }

// kernel: _lambda_.3
= control target key start
LH: loop header
LB: loop body
LE: loop exit
PB: predicated region body
PF: predicated region fallthrough
CT: control target
= control target key end

     0   :  { %s2845_s0 = inlined_call_operand.vmem [shape: bf16[32,256], index: 0, kind: input, shape index: {}]   ;;  %s2846_s1 = inlined_call_operand.vmem [shape: bf16[256,32], index: 1, kind: input, shape index: {}]   ;;  %s2847_s2 = inlined_call_operand.vmem [shape: f32[1,32], index: 2, kind: input, shape index: {}]   ;;  %s2848_s3 = inlined_call_operand.vmem [shape: bf16[9,32,32], index: 3, kind: input, shape index: {}]   ;;  %s2849_s4 = inlined_call_operand.vmem [shape: bf16[2,9,32,8], index: 4, kind: input, shape index: {}]   ;;  %s2850_s5 = inlined_call_operand.vmem [shape: f32[2,8,32], index: 5, kind: input, shape index: {}]   ;;  %s2851_s6 = inlined_call_operand.hbm [shape: f32[32,32], index: 6, kind: output, shape index: {}]  }
   0x1   :  { %v2225_v0 = vld [vmem:[%s2846_s1 + $0x38] sm:$0xff]  ;;  %v2224_v2 = vld [vmem:[%s2846_s1 + $0x30] sm:$0xff]  ;;  %v2223_v4 = vld [vmem:[%s2846_s1 + $0x28] sm:$0xff] }
   0x2   :  { %v2233_v1 = vld [vmem:[%s2846_s1 + $0x78] sm:$0xff]  ;;  %181 = vmatpush.bf16.msra.mxu0 %v2225_v0  ;;  %v2232_v3 = vld [vmem:[%s2846_s1 + $0x70] sm:$0xff]  ;;  %v2231_v5 = vld [vmem:[%s2846_s1 + $0x68] sm:$0xff] }
   0x3   :  { %200 = vmatpush.bf16.msra.mxu1 %v2233_v1 }
   0x6   :  { %182 = vmatpush.bf16.msra.mxu0 %v2224_v2 }
   0x7   :  { %201 = vmatpush.bf16.msra.mxu1 %v2232_v3 }
   0x8   :  { %11 = vsyncpa [#allocation3], 0  ;;  %v2222_v6 = vld [vmem:[%s2846_s1 + $0x20] sm:$0xff]  ;;  %v2221_v8 = vld [vmem:[%s2846_s1 + $0x18] sm:$0xff]  ;;  %vm239_vm0 = vcmask 261120   ;;  %vm1013_vm1 = vcmask 64512  }
   0x9   :  { %v2230_v7 = vld [vmem:[%s2846_s1 + $0x60] sm:$0xff]  ;;  %v2229_v9 = vld [vmem:[%s2846_s1 + $0x58] sm:$0xff]  ;;  %v2220_v10 = vld [vmem:[%s2846_s1 + $0x10] sm:$0xff]  ;;  %s1725_s23 = sshll.u32 %s2851_s6, 4  ;;  %s2323_s24 = smov 128   ;;  %s1726_s23 = int_to_ptr.hbm [resolvable:$true] %s1725_s23 }
   0xa   :  { %183 = vmatpush.bf16.msra.mxu0 %v2223_v4  ;;  %v2228_v11 = vld [vmem:[%s2846_s1 + $0x50] sm:$0xff]  ;;  %v2219_v12 = vld [vmem:[%s2846_s1 + $0x8] sm:$0xff]  ;;  %v2218_v14 = vld [vmem:[%s2846_s1] sm:$0xff]  ;;  %s2324_s25 = smov 8  }
   0xb   :  { %202 = vmatpush.bf16.msra.mxu1 %v2231_v5  ;;  %v2227_v13 = vld [vmem:[%s2846_s1 + $0x48] sm:$0xff]  ;;  %v2226_v15 = vld [vmem:[%s2846_s1 + $0x40] sm:$0xff]  ;;  %v1747_v22 = vld [vmem:[%s2845_s0 + $0x10] sm:$0xf] }
   0xc   :  { %v1739_v16 = vld [vmem:[%s2845_s0] sm:$0xf]  ;;  %v2215_v17 = vld [vmem:[%s2845_s0 + $0x4] sm:$0xf0]  ;;  %v2214_v18 = vld [vmem:[%s2845_s0 + $0x4] sm:$0xf] }
   0xd   :  { %v1741_v19 = vld [vmem:[%s2845_s0 + $0x8] sm:$0xf0]  ;;  %v1740_v20 = vor.u32 %v2215_v17, %v1739_v16  ;;  %v2217_v23 = vld [vmem:[%s2845_s0 + $0x14] sm:$0xf0]  ;;  %v2216_v24 = vld [vmem:[%s2845_s0 + $0x14] sm:$0xf] }
   0xe   :  { %184 = vmatpush.bf16.msra.mxu0 %v2222_v6  ;;  %v1744_v21 = vor.u32 %v2214_v18, %v1741_v19  ;;  %v1749_v25 = vld [vmem:[%s2845_s0 + $0x18] sm:$0xf0]  ;;  %v1748_v26 = vor.u32 %v2217_v23, %v1747_v22  ;;  %v2295_v34 = vld [vmem:[%s2847_s2] ss:$0 sm:$0xff]  ;;  %v2465_v53 = vld [vmem:[%s2848_s3 + $0x10] sm:$0xff] }
   0xf   :  { %203 = vmatpush.bf16.msra.mxu1 %v2230_v7  ;;  %v1752_v27 = vor.u32 %v2216_v24, %v1749_v25  ;;  %v2241_v50 = vld [vmem:[%s2849_s4 + $0x18] sm:$0xff]  ;;  %v2460_v52 = vld [vmem:[%s2848_s3] sm:$0xff]  ;;  %v2240_v55 = vld [vmem:[%s2849_s4 + $0x10] sm:$0xff] }
  0x10   :  { %v2472_v54 = vld [vmem:[%s2848_s3 + $0x20] sm:$0xff]  ;;  %v2493_v56 = vld [vmem:[%s2848_s3 + $0x8] sm:$0xff]  ;;  %v2498_v57 = vld [vmem:[%s2848_s3 + $0x18] sm:$0xff] }
  0x11   :  { %v2503_v58 = vld [vmem:[%s2848_s3 + $0x40] sm:$0xff]  ;;  %v2237_v59 = vld [vmem:[%s2849_s4 + $0x8] sm:$0xff]  ;;  %v2558_v17 = vld [vmem:[%s2848_s3 + $0x30] sm:$0xff] }
  0x12   :  { %185 = vmatpush.bf16.msra.mxu0 %v2221_v8  ;;  %v2236_v60 = vld [vmem:[%s2849_s4] sm:$0xff]  ;;  %v2245_v61 = vld [vmem:[%s2849_s4 + $0x28] sm:$0xff]  ;;  %v2574_v19 = vld [vmem:[%s2848_s3 + $0x38] sm:$0xff] }
  0x13   :  { %204 = vmatpush.bf16.msra.mxu1 %v2229_v9  ;;  %v2244_v62 = vld [vmem:[%s2849_s4 + $0x20] sm:$0xff]  ;;  %v2566_v18 = vld [vmem:[%s2848_s3 + $0x68] sm:$0xff]  ;;  %v2602_v23 = vld [vmem:[%s2848_s3 + $0x58] sm:$0xff] }
  0x14   :  { %v2550_v16 = vld [vmem:[%s2848_s3 + $0x60] sm:$0xff]  ;;  %v2595_v22 = vld [vmem:[%s2848_s3 + $0x88] sm:$0xff]  ;;  %v2609_v24 = vld [vmem:[%s2848_s3 + $0x70] sm:$0xff] }
  0x15   :  { %v2616_v25 = vld [vmem:[%s2848_s3 + $0x78] sm:$0xff] }
  0x16   :  { %186 = vmatpush.bf16.msra.mxu0 %v2220_v10 }
  0x17   :  { %205 = vmatpush.bf16.msra.mxu1 %v2228_v11 }
  0x1a   :  { %187 = vmatpush.bf16.msra.mxu0 %v2219_v12 }
  0x1b   :  { %206 = vmatpush.bf16.msra.mxu1 %v2227_v13 }
  0x1e   :  { %188 = vmatpush.bf16.msra.mxu0 %v2218_v14  ;;  %v2535_v14 = vld [vmem:[%s2848_s3 + $0x48] sm:$0xff] }
  0x1f   :  { %207 = vmatpush.bf16.msra.mxu1 %v2226_v15  ;;  %v2542_v15 = vld [vmem:[%s2848_s3 + $0x28] sm:$0xff] }
  0x21   :  { %189 = vmatmul.bf16.vlgmr.msra.gmra.mxu0 %v1740_v20  ;;  %v2581_v20 = vld [vmem:[%s2848_s3 + $0x80] sm:$0xff] }
  0x22   :  { %208 = vmatmul.bf16.vlgmr.msra.gmra.mxu1 %v1744_v21  ;;  %v2588_v21 = vld [vmem:[%s2848_s3 + $0x50] sm:$0xff] }
  0x23   :  { %463 = vmatpush.bf16.msrb.mxu1 %v2245_v61 }
  0x27   :  { %464 = vmatpush.bf16.msrb.mxu1 %v2244_v62 }
  0x31   :  { %194 = vmatmul.bf16.gmra.mxu0 %v1748_v26 }
  0x32   :  { %213 = vmatmul.bf16.gmra.mxu1 %v1752_v27 }
  0x9e   :  { %v190_v28 = vpop.f32.mrf.mxu0 }
  0x9f   :  { %v209_v29 = vpop.f32.mrf.mxu1  ;;  %v191_v38 = vadd.f32 %v2295_v34, %v190_v28 }
  0xa1   :  { %v2441_v44 = vadd.f32 %v209_v29, %v191_v38  ;;  %v2249_v38 = vld [vmem:[%s2849_s4 + $0x38] sm:$0xff] }
  0xa3   :  { %v219_v49 = vmax.f32 %v2441_v44, 0.0 }
  0xa6   :  { %v192_v30 = vpop.f32.mrf.mxu0 }
  0xa7   :  { %v211_v31 = vpop.f32.mrf.mxu1  ;;  %v193_v36 = vadd.f32 %v2295_v34, %v192_v30 }
  0xa9   :  { %v2437_v42 = vadd.f32 %v211_v31, %v193_v36 }
  0xab   :  { %v220_v47 = vmax.f32 %v2437_v42, 0.0 }
  0xad   :  { %v2455_v51 = vpack.c.bf16 %v220_v47, %v219_v49  ;;  %v2248_v47 = vld [vmem:[%s2849_s4 + $0x30] sm:$0xff] }
  0xae   :  { %v195_v32 = vpop.f32.mrf.mxu0 }
  0xaf   :  { %v214_v33 = vpop.f32.mrf.mxu1  ;;  %v196_v35 = vadd.f32 %v2295_v34, %v195_v32 }
  0xb1   :  { %v2435_v39 = vadd.f32 %v214_v33, %v196_v35 }
  0xb3   :  { %v221_v45 = vmax.f32 %v2435_v39, 0.0 }
  0xb6   :  { %v197_v37 = vpop.f32.mrf.mxu0 }
  0xb7   :  { %v198_v40 = vadd.f32 %v2295_v34, %v197_v37  ;;  %v216_v41 = vpop.f32.mrf.mxu1  ;;  %v2253_v34 = vld [vmem:[%s2849_s4 + $0x48] sm:$0xff]  ;;  %v2252_v37 = vld [vmem:[%s2849_s4 + $0x40] sm:$0xff] }
  0xb8   :  { %639 = vmatpush.bf16.msra.mxu1 %v2253_v34 }
  0xb9   :  { %v2439_v43 = vadd.f32 %v216_v41, %v198_v40 }
  0xbb   :  { %v222_v46 = vmax.f32 %v2439_v43, 0.0 }
  0xbc   :  { %640 = vmatpush.bf16.msra.mxu1 %v2252_v37 }
  0xbd   :  { %v2446_v48 = vpack.c.bf16 %v222_v46, %v221_v45 }
  0xbf   :  { %252 = vmatpush.bf16.msra.mxu2 %v2446_v48  ;;  %298 = vmatpush.bf16.msra.mxu3 %v2446_v48 }
  0xc0   :  { %419 = vmatpush.bf16.msrb.mxu0 %v2446_v48 }
  0xc3   :  { %253 = vmatpush.bf16.msra.mxu2 %v2455_v51  ;;  %299 = vmatpush.bf16.msra.mxu3 %v2455_v51 }
  0xc4   :  { %420 = vmatpush.bf16.msrb.mxu0 %v2455_v51 }
  0xc6   :  { %1825 = vmatmul.msk.bf16.vlgmr.msra.gmra.mxu2 %vm239_vm0, %v2460_v52  ;;  %1839 = vmatmul.msk.bf16.vlgmr.msra.gmra.mxu3 %vm239_vm0, %v2465_v53 }
  0xc7   :  { %342 = vmatpush.bf16.msrb.mxu2 %v2241_v50  ;;  %1877 = vmatmul.msk.bf16.vlgmr.msrb.gmra.mxu0 %vm239_vm0, %v2472_v54 }
  0xc8   :  { %595 = vmatpush.bf16.msra.mxu0 %v2446_v48  ;;  %379 = vmatpush.bf16.msrb.mxu3 %v2237_v59 }
  0xcb   :  { %343 = vmatpush.bf16.msrb.mxu2 %v2240_v55 }
  0xcc   :  { %596 = vmatpush.bf16.msra.mxu0 %v2455_v51  ;;  %380 = vmatpush.bf16.msrb.mxu3 %v2236_v60 }
  0xcf   :  { %2288 = vmatpush.bf16.msra.mxu2 %v2446_v48 }
  0xd0   :  { %771 = vmatpush.bf16.msrb.mxu0 %v2446_v48  ;;  %2290 = vmatpush.bf16.msra.mxu3 %v2245_v61  ;;  %v2261_v61 = vld [vmem:[%s2849_s4 + $0x68] sm:$0xff] }
  0xd3   :  { %2289 = vmatpush.bf16.msra.mxu2 %v2455_v51 }
  0xd4   :  { %772 = vmatpush.bf16.msrb.mxu0 %v2455_v51  ;;  %2291 = vmatpush.bf16.msra.mxu3 %v2244_v62 }
  0xd6   :  { %1826 = vmatmul.msk.bf16.gmra.mxu2 %vm239_vm0, %v2493_v56  ;;  %1840 = vmatmul.msk.bf16.gmra.mxu3 %vm239_vm0, %v2498_v57 }
  0xd7   :  { %1933 = vmatmul.msk.bf16.vlgmr.msra.gmra.mxu0 %vm239_vm0, %v2503_v58 }
  0xd8   :  { %947 = vmatpush.bf16.msra.mxu0 %v2446_v48 }
  0xdc   :  { %948 = vmatpush.bf16.msra.mxu0 %v2455_v51 }
  0xe7   :  { %1934 = vmatmul.msk.bf16.gmra.mxu0 %vm239_vm0, %v2535_v14 }
  0xf7   :  { %1989 = vmatmul.msk.bf16.vlgmr.msrb.gmra.mxu0 %vm239_vm0, %v2550_v16 }
 0x107   :  { %1990 = vmatmul.msk.bf16.gmra.mxu0 %vm239_vm0, %v2566_v18 }
 0x117   :  { %2045 = vmatmul.msk.bf16.vlgmr.msra.gmra.mxu0 %vm239_vm0, %v2581_v20 }
 0x127   :  { %2046 = vmatmul.msk.bf16.gmra.mxu0 %vm239_vm0, %v2595_v22 }
 0x144   :  { %v422_v63 = vpop.f32.mrf.mxu0 }
 0x149   :  { %v255_v0 = vpop.f32.mrf.mxu2  ;;  %v301_v1 = vpop.f32.mrf.mxu3 }
 0x14c   :  { %v424_v2 = vpop.f32.mrf.mxu0 }
 0x14d   :  { %v432_v3 = vpack.c.bf16 %v424_v2, %v422_v63  ;;  %v2260_v63 = vld [vmem:[%s2849_s4 + $0x60] sm:$0xff] }
 0x14f   :  { %1891 = vmatmul.msk.bf16.vlgmr.msrb.gmra.mxu1 %vm239_vm0, %v432_v3 }
 0x150   :  { %815 = vmatpush.bf16.msrb.mxu1 %v2261_v61 }
 0x151   :  { %v257_v4 = vpop.f32.mrf.mxu2  ;;  %v303_v5 = vpop.f32.mrf.mxu3 }
 0x152   :  { %v265_v6 = vpack.c.bf16 %v257_v4, %v255_v0  ;;  %v311_v7 = vpack.c.bf16 %v303_v5, %v301_v1  ;;  %v2257_v0 = vld [vmem:[%s2849_s4 + $0x58] sm:$0xff]  ;;  %v2256_v4 = vld [vmem:[%s2849_s4 + $0x50] sm:$0xff] }
 0x154   :  { %1853 = vmatmul.msk.bf16.vlgmr.msrb.gmra.mxu2 %vm239_vm0, %v311_v7  ;;  %1863 = vmatmul.msk.bf16.vlgmr.msrb.gmra.mxu3 %vm239_vm0, %v265_v6  ;;  %v598_v33 = vpop.f32.mrf.mxu0 }
 0x155   :  { %507 = vmatpush.bf16.msrb.mxu2 %v2446_v48  ;;  %551 = vmatpush.bf16.msrb.mxu3 %v2249_v38 }
 0x156   :  { %816 = vmatpush.bf16.msrb.mxu1 %v2260_v63 }
 0x159   :  { %508 = vmatpush.bf16.msrb.mxu2 %v2455_v51  ;;  %v260_v8 = vpop.f32.mrf.mxu2  ;;  %v306_v9 = vpop.f32.mrf.mxu3  ;;  %552 = vmatpush.bf16.msrb.mxu3 %v2248_v47 }
 0x15c   :  { %v600_v41 = vpop.f32.mrf.mxu0 }
 0x15d   :  { %v608_v45 = vpack.c.bf16 %v600_v41, %v598_v33 }
 0x15f   :  { %1947 = vmatmul.msk.bf16.vlgmr.msra.gmra.mxu1 %vm239_vm0, %v608_v45 }
 0x161   :  { %v262_v10 = vpop.f32.mrf.mxu2  ;;  %v308_v11 = vpop.f32.mrf.mxu3 }
 0x162   :  { %v266_v12 = vpack.c.bf16 %v262_v10, %v260_v8  ;;  %v312_v13 = vpack.c.bf16 %v308_v11, %v306_v9 }
 0x164   :  { %1854 = vmatmul.msk.bf16.gmra.mxu2 %vm239_vm0, %v312_v13  ;;  %1864 = vmatmul.msk.bf16.gmra.mxu3 %vm239_vm0, %v266_v12  ;;  %v2269_v13 = vld [vmem:[%s2849_s4 + $0x88] sm:$0xff] }
 0x165   :  { %991 = vmatpush.bf16.msra.mxu1 %v2269_v13  ;;  %v1012_v13 = vld [vmem:[%s2850_s5] sm:$0xff] }
 0x174   :  { %1878 = vmatmul.msk.bf16.vlgmr.msra.gmra.mxu2 %vm239_vm0, %v2542_v15 }
 0x175   :  { %683 = vmatpush.bf16.msra.mxu2 %v2446_v48 }
 0x179   :  { %684 = vmatpush.bf16.msra.mxu2 %v2455_v51 }
 0x184   :  { %1905 = vmatmul.msk.bf16.vlgmr.msrb.gmra.mxu2 %vm239_vm0, %v2558_v17 }
 0x185   :  { %859 = vmatpush.bf16.msrb.mxu2 %v2446_v48  ;;  %v603_v48 = vpop.f32.mrf.mxu0 }
 0x189   :  { %860 = vmatpush.bf16.msrb.mxu2 %v2455_v51 }
 0x18d   :  { %v605_v50 = vpop.f32.mrf.mxu0 }
 0x18e   :  { %v609_v51 = vpack.c.bf16 %v605_v50, %v603_v48 }
 0x190   :  { %1948 = vmatmul.msk.bf16.gmra.mxu1 %vm239_vm0, %v609_v51 }
 0x194   :  { %1906 = vmatmul.msk.bf16.gmra.mxu2 %vm239_vm0, %v2574_v19 }
 0x195   :  { %v774_v60 = vpop.f32.mrf.mxu0 }
 0x19d   :  { %v776_v1 = vpop.f32.mrf.mxu0 }
 0x19e   :  { %v784_v2 = vpack.c.bf16 %v776_v1, %v774_v60 }
 0x1a0   :  { %2003 = vmatmul.msk.bf16.vlgmr.msrb.gmra.mxu1 %vm239_vm0, %v784_v2 }
 0x1a4   :  { %1961 = vmatmul.msk.bf16.vlgmr.msra.gmra.mxu2 %vm239_vm0, %v2588_v21 }
 0x1a5   :  { %v779_v6 = vpop.f32.mrf.mxu0  ;;  %1041 = vmatpush.msra.mxu2 %v1012_v13 }
 0x1ad   :  { %v781_v8 = vpop.f32.mrf.mxu0 }
 0x1ae   :  { %v785_v9 = vpack.c.bf16 %v781_v8, %v779_v6 }
 0x1b0   :  { %2004 = vmatmul.msk.bf16.gmra.mxu1 %vm239_vm0, %v785_v9 }
 0x1b4   :  { %1962 = vmatmul.msk.bf16.gmra.mxu2 %vm239_vm0, %v2602_v23 }
 0x1b5   :  { %v950_v12 = vpop.f32.mrf.mxu0 }
 0x1c4   :  { %2017 = vmatmul.msk.bf16.vlgmr.msrb.gmra.mxu2 %vm239_vm0, %v2609_v24 }
 0x1cc   :  { %v466_v26 = vpop.f32.mrf.mxu1 }
 0x1d4   :  { %2018 = vmatmul.msk.bf16.gmra.mxu2 %vm239_vm0, %v2616_v25  ;;  %v468_v61 = vpop.f32.mrf.mxu1 }
 0x1d7   :  { %v345_v27 = vpop.f32.mrf.mxu2  ;;  %v382_v28 = vpop.f32.mrf.mxu3 }
 0x1d8   :  { %v383_v29 = vadd.f32 %v382_v28, %v345_v27  ;;  %v2268_v27 = vld [vmem:[%s2849_s4 + $0x80] sm:$0xff]  ;;  %v2265_v28 = vld [vmem:[%s2849_s4 + $0x78] sm:$0xff] }
 0x1d9   :  { %992 = vmatpush.bf16.msra.mxu1 %v2268_v27 }
 0x1da   :  { %v2620_v30 = vadd.f32 %v466_v26, %v383_v29  ;;  %v952_v29 = vpop.f32.mrf.mxu0 }
 0x1db   :  { %v960_v33 = vpack.c.bf16 %v952_v29, %v950_v12 }
 0x1dc   :  { %v642_v63 = vpop.f32.mrf.mxu1 }
 0x1dd   :  { %2059 = vmatmul.msk.bf16.vlgmr.msra.gmra.mxu1 %vm239_vm0, %v960_v33 }
 0x1df   :  { %v2622_v31 = vpop.f32.mrf.mxu2  ;;  %v2624_v32 = vpop.f32.mrf.mxu3 }
 0x1e0   :  { %v385_v33 = vadd.f32 %v2624_v32, %v2622_v31 }
 0x1e2   :  { %v955_v37 = vpop.f32.mrf.mxu0 }
 0x1e4   :  { %v644_v2 = vpop.f32.mrf.mxu1 }
 0x1e7   :  { %v350_v35 = vpop.f32.mrf.mxu2  ;;  %v387_v36 = vpop.f32.mrf.mxu3 }
 0x1e8   :  { %v2635_v40 = vadd.f32 %v387_v36, %v350_v35  ;;  %v2264_v35 = vld [vmem:[%s2849_s4 + $0x70] sm:$0xff] }
 0x1ea   :  { %v957_v41 = vpop.f32.mrf.mxu0 }
 0x1eb   :  { %v961_v45 = vpack.c.bf16 %v957_v41, %v955_v37 }
 0x1ed   :  { %2060 = vmatmul.msk.bf16.gmra.mxu1 %vm239_vm0, %v961_v45 }
 0x1ef   :  { %v2638_v46 = vpop.f32.mrf.mxu2 }
 0x1f7   :  { %v427_v49 = vpop.f32.mrf.mxu2 }
 0x1ff   :  { %v429_v55 = vpop.f32.mrf.mxu2 }
 0x200   :  { %v433_v59 = vpack.c.bf16 %v429_v55, %v427_v49 }
 0x202   :  { %1892 = vmatmul.msk.bf16.vlgmr.msra.gmra.mxu3 %vm239_vm0, %v433_v59 }
 0x203   :  { %727 = vmatpush.bf16.msra.mxu3 %v2257_v0 }
 0x207   :  { %v510_v62 = vpop.f32.mrf.mxu2  ;;  %728 = vmatpush.bf16.msra.mxu3 %v2256_v4 }
 0x20f   :  { %v512_v3 = vpop.f32.mrf.mxu2 }
 0x210   :  { %v520_v5 = vpack.c.bf16 %v512_v3, %v510_v62  ;;  %v389_v62 = vpop.f32.mrf.mxu3 }
 0x211   :  { %v390_v32 = vadd.f32 %v389_v62, %v2638_v46 }
 0x212   :  { %1919 = vmatmul.msk.bf16.vlgmr.msrb.gmra.mxu3 %vm239_vm0, %v520_v5  ;;  %v647_v5 = vpop.f32.mrf.mxu1 }
 0x213   :  { %903 = vmatpush.bf16.msrb.mxu3 %v2265_v28 }
 0x217   :  { %v515_v7 = vpop.f32.mrf.mxu2  ;;  %904 = vmatpush.bf16.msrb.mxu3 %v2264_v35 }
 0x21f   :  { %v517_v10 = vpop.f32.mrf.mxu2 }
 0x220   :  { %v521_v11 = vpack.c.bf16 %v517_v10, %v515_v7  ;;  %v649_v7 = vpop.f32.mrf.mxu1 }
 0x222   :  { %1920 = vmatmul.msk.bf16.gmra.mxu3 %vm239_vm0, %v521_v11 }
 0x227   :  { %v686_v26 = vpop.f32.mrf.mxu2 }
 0x228   :  { %v818_v9 = vpop.f32.mrf.mxu1 }
 0x22f   :  { %v688_v34 = vpop.f32.mrf.mxu2 }
 0x230   :  { %v696_v36 = vpack.c.bf16 %v688_v34, %v686_v26  ;;  %v820_v11 = vpop.f32.mrf.mxu1 }
 0x232   :  { %1975 = vmatmul.msk.bf16.vlgmr.msra.gmra.mxu3 %vm239_vm0, %v696_v36  ;;  %v477_v36 = vadd.f32 %v468_v61, %v385_v33 }
 0x237   :  { %v691_v38 = vpop.f32.mrf.mxu2 }
 0x238   :  { %v823_v26 = vpop.f32.mrf.mxu1 }
 0x23f   :  { %v693_v47 = vpop.f32.mrf.mxu2 }
 0x240   :  { %v697_v48 = vpack.c.bf16 %v693_v47, %v691_v38 }
 0x242   :  { %1976 = vmatmul.msk.bf16.gmra.mxu3 %vm239_vm0, %v697_v48 }
 0x247   :  { %v862_v49 = vpop.f32.mrf.mxu2 }
 0x24f   :  { %v864_v50 = vpop.f32.mrf.mxu2 }
 0x250   :  { %v872_v51 = vpack.c.bf16 %v864_v50, %v862_v49 }
 0x252   :  { %2031 = vmatmul.msk.bf16.vlgmr.msrb.gmra.mxu3 %vm239_vm0, %v872_v51 }
 0x257   :  { %v867_v55 = vpop.f32.mrf.mxu2 }
 0x25f   :  { %v869_v59 = vpop.f32.mrf.mxu2 }
 0x260   :  { %v873_v60 = vpack.c.bf16 %v869_v59, %v867_v55 }
 0x262   :  { %2032 = vmatmul.msk.bf16.gmra.mxu3 %vm239_vm0, %v873_v60 }
 0x285   :  { %v471_v0 = vpop.f32.mrf.mxu3 }
 0x286   :  { %v478_v1 = vadd.f32 %v471_v0, %v2635_v40  ;;  %v825_v40 = vpop.f32.mrf.mxu1 }
 0x28d   :  { %v473_v3 = vpop.f32.mrf.mxu3 }
 0x28e   :  { %v994_v38 = vpop.f32.mrf.mxu1  ;;  %v479_v0 = vadd.f32 %v473_v3, %v390_v32 }
 0x295   :  { %v554_v4 = vpop.f32.mrf.mxu3 }
 0x296   :  { %v564_v29 = vadd.f32 %v554_v4, %v2620_v30  ;;  %v996_v60 = vpop.f32.mrf.mxu1 }
 0x298   :  { %v652_v35 = vadd.f32 %v642_v63, %v564_v29 }
 0x29d   :  { %v556_v6 = vpop.f32.mrf.mxu3 }
 0x29e   :  { %v565_v41 = vadd.f32 %v556_v6, %v477_v36  ;;  %v999_v13 = vpop.f32.mrf.mxu1 }
 0x2a0   :  { %v653_v48 = vadd.f32 %v644_v2, %v565_v41 }
 0x2a5   :  { %v559_v8 = vpop.f32.mrf.mxu3 }
 0x2a6   :  { %v566_v55 = vadd.f32 %v559_v8, %v478_v1  ;;  %v1001_v3 = vpop.f32.mrf.mxu1 }
 0x2a8   :  { %v654_v61 = vadd.f32 %v647_v5, %v566_v55 }
 0x2ad   :  { %v561_v10 = vpop.f32.mrf.mxu3 }
 0x2b5   :  { %v730_v12 = vpop.f32.mrf.mxu3 }
 0x2b6   :  { %v740_v37 = vadd.f32 %v730_v12, %v652_v35 }
 0x2b8   :  { %v828_v45 = vadd.f32 %v818_v9, %v740_v37  ;;  %v567_v9 = vadd.f32 %v561_v10, %v479_v0  ;;  %v2273_v10 = vld [vmem:[%s2849_s4 + $0xa8] sm:$0xff] }
 0x2b9   :  { %1141 = vmatpush.bf16.msrb.mxu1 %v2273_v10 }
 0x2ba   :  { %v655_v8 = vadd.f32 %v649_v7, %v567_v9  ;;  %v2272_v7 = vld [vmem:[%s2849_s4 + $0xa0] sm:$0xff] }
 0x2bd   :  { %v732_v27 = vpop.f32.mrf.mxu3  ;;  %1142 = vmatpush.bf16.msrb.mxu1 %v2272_v7 }
 0x2be   :  { %v741_v50 = vadd.f32 %v732_v27, %v653_v48 }
 0x2c0   :  { %v829_v30 = vadd.f32 %v820_v11, %v741_v50 }
 0x2c5   :  { %v735_v28 = vpop.f32.mrf.mxu3 }
 0x2c6   :  { %v742_v4 = vadd.f32 %v735_v28, %v654_v61 }
 0x2c8   :  { %v830_v12 = vadd.f32 %v823_v26, %v742_v4  ;;  %v2276_v4 = vld [vmem:[%s2849_s4 + $0xc0] sm:$0xff] }
 0x2cd   :  { %v737_v34 = vpop.f32.mrf.mxu3 }
 0x2ce   :  { %v743_v29 = vadd.f32 %v737_v34, %v655_v8 }
 0x2d0   :  { %v831_v46 = vadd.f32 %v825_v40, %v743_v29 }
 0x2d5   :  { %v906_v47 = vpop.f32.mrf.mxu3 }
 0x2d6   :  { %v916_v49 = vadd.f32 %v906_v47, %v828_v45 }
 0x2d8   :  { %v1004_v51 = vadd.f32 %v994_v38, %v916_v49 }
 0x2da   :  { %v1008_v59 = vmax.f32 %v1004_v51, 0.0 }
 0x2dc   :  { %2061 = vmatmul.msk.f32.vlgmr.msra.gmra.mxu2 %vm1013_vm1, %v1008_v59 }
 0x2dd   :  { %v908_v31 = vpop.f32.mrf.mxu3 }
 0x2de   :  { %v917_v63 = vadd.f32 %v908_v31, %v829_v30 }
 0x2e0   :  { %v1005_v6 = vadd.f32 %v996_v60, %v917_v63 }
 0x2e2   :  { %v1009_v2 = vmax.f32 %v1005_v6, 0.0 }
 0x2e4   :  { %2062 = vmatmul.msk.f32.gmra.mxu2 %vm1013_vm1, %v1009_v2 }
 0x2e5   :  { %v911_v1 = vpop.f32.mrf.mxu3 }
 0x2e6   :  { %v918_v27 = vadd.f32 %v911_v1, %v830_v12 }
 0x2e8   :  { %v1006_v33 = vadd.f32 %v999_v13, %v918_v27 }
 0x2ea   :  { %v1010_v11 = vmax.f32 %v1006_v33, 0.0 }
 0x2ec   :  { %2063 = vmatmul.msk.f32.gmra.mxu2 %vm1013_vm1, %v1010_v11 }
 0x2ed   :  { %v913_v62 = vpop.f32.mrf.mxu3 }
 0x2ee   :  { %v919_v5 = vadd.f32 %v913_v62, %v831_v46  ;;  %v2283_v46 = vld [vmem:[%s2849_s4 + $0xf8] sm:$0xff] }
 0x2f0   :  { %v1007_v28 = vadd.f32 %v1001_v3, %v919_v5  ;;  %v2281_v3 = vld [vmem:[%s2849_s4 + $0xe8] sm:$0xff] }
 0x2f2   :  { %v1011_v35 = vmax.f32 %v1007_v28, 0.0  ;;  %v2282_v28 = vld [vmem:[%s2849_s4 + $0xf0] sm:$0xff] }
 0x2f4   :  { %2064 = vmatmul.msk.f32.gmra.mxu2 %vm1013_vm1, %v1011_v35 }
 0x35f   :  { %v1043_v26 = vpop.f32.mrf.mxu2 }
 0x360   :  { %v2707_v45 = vadd.f32 %v1043_v26, %v2441_v44  ;;  %v2270_v44 = vld [vmem:[%s2849_s4 + $0x90] sm:$0xff] }
 0x367   :  { %v1046_v34 = vpop.f32.mrf.mxu2 }
 0x368   :  { %v2701_v38 = vadd.f32 %v1046_v34, %v2437_v42 }
 0x36a   :  { %v1060_v49 = vmax.f32 %v2701_v38, 0.0 }
 0x36f   :  { %v1049_v40 = vpop.f32.mrf.mxu2 }
 0x370   :  { %v2698_v36 = vadd.f32 %v1049_v40, %v2435_v39  ;;  %v1059_v39 = vmax.f32 %v2707_v45, 0.0  ;;  %v2280_v40 = vld [vmem:[%s2849_s4 + $0xe0] sm:$0xff] }
 0x372   :  { %v1061_v47 = vmax.f32 %v2698_v36, 0.0  ;;  %v1063_v42 = vpack.c.bf16 %v1060_v49, %v1059_v39 }
 0x377   :  { %v1052_v37 = vpop.f32.mrf.mxu2 }
 0x378   :  { %v2704_v41 = vadd.f32 %v1052_v37, %v2439_v43  ;;  %v2271_v43 = vld [vmem:[%s2849_s4 + $0x98] sm:$0xff] }
 0x379   :  { %1178 = vmatpush.bf16.msrb.mxu2 %v2271_v43 }
 0x37a   :  { %v1062_v48 = vmax.f32 %v2704_v41, 0.0 }
 0x37c   :  { %v1064_v50 = vpack.c.bf16 %v1062_v48, %v1061_v47 }
 0x37d   :  { %1179 = vmatpush.bf16.msrb.mxu2 %v2270_v44 }
 0x37e   :  { %1071 = vmatpush.bf16.msra.mxu3 %v1064_v50  ;;  %1097 = vmatpush.bf16.msrb.mxu0 %v1064_v50 }
 0x37f   :  { %1264 = vmatpush.bf16.msra.mxu1 %v1064_v50 }
 0x382   :  { %1072 = vmatpush.bf16.msra.mxu3 %v1063_v42  ;;  %1098 = vmatpush.bf16.msrb.mxu0 %v1063_v42 }
 0x383   :  { %1265 = vmatpush.bf16.msra.mxu1 %v1063_v42 }
 0x385   :  { %2065 = vmatmul.msk.bf16.vlgmr.msra.gmra.mxu3 %vm239_vm0, %v2460_v52  ;;  %2071 = vmatmul.msk.bf16.vlgmr.msrb.gmra.mxu0 %vm239_vm0, %v2465_v53 }
 0x386   :  { %1197 = vmatpush.bf16.msrb.mxu3 %v1064_v50 }
 0x38a   :  { %1198 = vmatpush.bf16.msrb.mxu3 %v1063_v42 }
 0x38e   :  { %1331 = vmatpush.bf16.msra.mxu3 %v1064_v50 }
 0x392   :  { %1332 = vmatpush.bf16.msra.mxu3 %v1063_v42 }
 0x395   :  { %2066 = vmatmul.msk.bf16.gmra.mxu3 %vm239_vm0, %v2493_v56  ;;  %2072 = vmatmul.msk.bf16.gmra.mxu0 %vm239_vm0, %v2498_v57 }
 0x3a5   :  { %2097 = vmatmul.msk.bf16.vlgmr.msrb.gmra.mxu3 %vm239_vm0, %v2472_v54  ;;  %v2275_v54 = vld [vmem:[%s2849_s4 + $0xb8] sm:$0xff] }
 0x3a6   :  { %1465 = vmatpush.bf16.msrb.mxu3 %v1064_v50  ;;  %1241 = vmatpush.bf16.msra.mxu0 %v2275_v54 }
 0x3aa   :  { %1466 = vmatpush.bf16.msrb.mxu3 %v1063_v42 }
 0x3b5   :  { %2098 = vmatmul.msk.bf16.gmra.mxu3 %vm239_vm0, %v2542_v15 }
 0x3c5   :  { %2129 = vmatmul.msk.bf16.vlgmr.msra.gmra.mxu3 %vm239_vm0, %v2503_v58 }
 0x3c6   :  { %1599 = vmatpush.bf16.msra.mxu3 %v1064_v50 }
 0x3ca   :  { %1600 = vmatpush.bf16.msra.mxu3 %v1063_v42 }
 0x3d5   :  { %2130 = vmatmul.msk.bf16.gmra.mxu3 %vm239_vm0, %v2535_v14  ;;  %v2274_v14 = vld [vmem:[%s2849_s4 + $0xb0] sm:$0xff] }
 0x3d6   :  { %1242 = vmatpush.bf16.msra.mxu0 %v2274_v14  ;;  %v2286_v14 = vld [vmem:[%s2849_s4 + $0x110] sm:$0xff] }
 0x3e5   :  { %2161 = vmatmul.msk.bf16.vlgmr.msrb.gmra.mxu3 %vm239_vm0, %v2550_v16 }
 0x3f5   :  { %2162 = vmatmul.msk.bf16.gmra.mxu3 %vm239_vm0, %v2566_v18 }
 0x402   :  { %v1100_v52 = vpop.f32.mrf.mxu0 }
 0x405   :  { %2193 = vmatmul.msk.bf16.vlgmr.msra.gmra.mxu3 %vm239_vm0, %v2581_v20 }
 0x408   :  { %v1074_v53 = vpop.f32.mrf.mxu3 }
 0x40a   :  { %v1102_v56 = vpop.f32.mrf.mxu0 }
 0x40b   :  { %v1110_v57 = vpack.c.bf16 %v1102_v56, %v1100_v52  ;;  %v2287_v56 = vld [vmem:[%s2849_s4 + $0x118] sm:$0xff] }
 0x40d   :  { %2085 = vmatmul.msk.bf16.vlgmr.msrb.gmra.mxu1 %vm239_vm0, %v1110_v57 }
 0x40e   :  { %1398 = vmatpush.bf16.msrb.mxu1 %v1064_v50 }
 0x410   :  { %v1076_v58 = vpop.f32.mrf.mxu3 }
 0x411   :  { %v1084_v15 = vpack.c.bf16 %v1076_v58, %v1074_v53  ;;  %v2285_v58 = vld [vmem:[%s2849_s4 + $0x108] sm:$0xff] }
 0x412   :  { %1399 = vmatpush.bf16.msrb.mxu1 %v1063_v42  ;;  %v1105_v16 = vpop.f32.mrf.mxu0 }
 0x413   :  { %2095 = vmatmul.msk.bf16.vlgmr.msrb.gmra.mxu2 %vm239_vm0, %v1084_v15 }
 0x415   :  { %2194 = vmatmul.msk.bf16.gmra.mxu3 %vm239_vm0, %v2595_v22 }
 0x418   :  { %v1079_v18 = vpop.f32.mrf.mxu3 }
 0x41a   :  { %v1107_v20 = vpop.f32.mrf.mxu0 }
 0x41b   :  { %v1111_v51 = vpack.c.bf16 %v1107_v20, %v1105_v16  ;;  %v2284_v20 = vld [vmem:[%s2849_s4 + $0x100] sm:$0xff] }
 0x41d   :  { %2086 = vmatmul.msk.bf16.gmra.mxu1 %vm239_vm0, %v1111_v51 }
 0x420   :  { %v1081_v55 = vpop.f32.mrf.mxu3 }
 0x421   :  { %v1085_v59 = vpack.c.bf16 %v1081_v55, %v1079_v18 }
 0x423   :  { %2096 = vmatmul.msk.bf16.gmra.mxu2 %vm239_vm0, %v1085_v59 }
 0x428   :  { %v1200_v60 = vpop.f32.mrf.mxu3 }
 0x42d   :  { %2113 = vmatmul.msk.bf16.vlgmr.msra.gmra.mxu1 %vm239_vm0, %v2558_v17 }
 0x42e   :  { %1532 = vmatpush.bf16.msra.mxu1 %v1064_v50 }
 0x430   :  { %v1202_v30 = vpop.f32.mrf.mxu3 }
 0x431   :  { %v1210_v31 = vpack.c.bf16 %v1202_v30, %v1200_v60 }
 0x432   :  { %1533 = vmatpush.bf16.msra.mxu1 %v1063_v42 }
 0x433   :  { %2111 = vmatmul.msk.bf16.vlgmr.msra.gmra.mxu0 %vm239_vm0, %v1210_v31 }
 0x438   :  { %v1205_v22 = vpop.f32.mrf.mxu3 }
 0x43d   :  { %2114 = vmatmul.msk.bf16.gmra.mxu1 %vm239_vm0, %v2574_v19  ;;  %v2279_v19 = vld [vmem:[%s2849_s4 + $0xd8] sm:$0xff] }
 0x43e   :  { %1375 = vmatpush.bf16.msrb.mxu0 %v2279_v19 }
 0x440   :  { %v1207_v32 = vpop.f32.mrf.mxu3 }
 0x441   :  { %v1211_v61 = vpack.c.bf16 %v1207_v32, %v1205_v22 }
 0x443   :  { %2112 = vmatmul.msk.bf16.gmra.mxu0 %vm239_vm0, %v1211_v61 }
 0x448   :  { %v1334_v17 = vpop.f32.mrf.mxu3 }
 0x44d   :  { %2145 = vmatmul.msk.bf16.vlgmr.msrb.gmra.mxu1 %vm239_vm0, %v2588_v21  ;;  %v2278_v21 = vld [vmem:[%s2849_s4 + $0xd0] sm:$0xff] }
 0x44e   :  { %1376 = vmatpush.bf16.msrb.mxu0 %v2278_v21 }
 0x450   :  { %v1336_v0 = vpop.f32.mrf.mxu3 }
 0x452   :  { %1509 = vmatpush.bf16.msra.mxu0 %v2283_v46 }
 0x456   :  { %1510 = vmatpush.bf16.msra.mxu0 %v2282_v28 }
 0x458   :  { %v1339_v6 = vpop.f32.mrf.mxu3 }
 0x45d   :  { %2146 = vmatmul.msk.bf16.gmra.mxu1 %vm239_vm0, %v2602_v23  ;;  %v1344_v23 = vpack.c.bf16 %v1336_v0, %v1334_v17 }
 0x45f   :  { %2143 = vmatmul.msk.bf16.vlgmr.msrb.gmra.mxu0 %vm239_vm0, %v1344_v23 }
 0x460   :  { %v1341_v13 = vpop.f32.mrf.mxu3  ;;  %1643 = vmatpush.bf16.msrb.mxu0 %v2287_v56 }
 0x461   :  { %v1345_v1 = vpack.c.bf16 %v1341_v13, %v1339_v6 }
 0x464   :  { %1644 = vmatpush.bf16.msrb.mxu0 %v2286_v14 }
 0x468   :  { %v1468_v33 = vpop.f32.mrf.mxu3 }
 0x46d   :  { %2177 = vmatmul.msk.bf16.vlgmr.msra.gmra.mxu1 %vm239_vm0, %v2609_v24  ;;  %v2277_v24 = vld [vmem:[%s2849_s4 + $0xc8] sm:$0xff] }
 0x46e   :  { %1308 = vmatpush.bf16.msra.mxu2 %v2277_v24 }
 0x46f   :  { %2144 = vmatmul.msk.bf16.gmra.mxu0 %vm239_vm0, %v1345_v1 }
 0x470   :  { %v1470_v35 = vpop.f32.mrf.mxu3 }
 0x471   :  { %v1478_v10 = vpack.c.bf16 %v1470_v35, %v1468_v33  ;;  %v2209_v33 = vld [vmem:[%s2850_s5 + $0x8] sm:$0xff]  ;;  %s2322_s5 = smov [#allocation2]  }
 0x472   :  { %1309 = vmatpush.bf16.msra.mxu2 %v2276_v4  ;;  %1693 = vmatpush.msrb.mxu1 %v2209_v33  ;;  %s1723_s0 = sshll.u32 %s2322_s5, 4  ;;  %s1724_s0 = int_to_ptr.vmem [resolvable:$true] %s1723_s0 }
 0x476   :  { %1442 = vmatpush.bf16.msrb.mxu2 %v2281_v3 }
 0x478   :  { %v1473_v47 = vpop.f32.mrf.mxu3 }
 0x47a   :  { %1443 = vmatpush.bf16.msrb.mxu2 %v2280_v40 }
 0x47d   :  { %2178 = vmatmul.msk.bf16.gmra.mxu1 %vm239_vm0, %v2616_v25 }
 0x47f   :  { %2175 = vmatmul.msk.bf16.vlgmr.msra.gmra.mxu0 %vm239_vm0, %v1478_v10 }
 0x480   :  { %v1475_v39 = vpop.f32.mrf.mxu3 }
 0x481   :  { %v1479_v42 = vpack.c.bf16 %v1475_v39, %v1473_v47 }
 0x488   :  { %v1602_v54 = vpop.f32.mrf.mxu3 }
 0x48a   :  { %v1144_v63 = vpop.f32.mrf.mxu1 }
 0x48f   :  { %2176 = vmatmul.msk.bf16.gmra.mxu0 %vm239_vm0, %v1479_v42 }
 0x490   :  { %v1604_v15 = vpop.f32.mrf.mxu3 }
 0x491   :  { %v1612_v16 = vpack.c.bf16 %v1604_v15, %v1602_v54 }
 0x492   :  { %v1146_v25 = vpop.f32.mrf.mxu1 }
 0x496   :  { %v1181_v9 = vpop.f32.mrf.mxu2 }
 0x497   :  { %v1182_v2 = vadd.f32 %v1181_v9, %v1144_v63 }
 0x498   :  { %v1607_v55 = vpop.f32.mrf.mxu3 }
 0x49a   :  { %v1149_v12 = vpop.f32.mrf.mxu1 }
 0x49e   :  { %v1183_v8 = vpop.f32.mrf.mxu2 }
 0x49f   :  { %v1184_v27 = vadd.f32 %v1183_v8, %v1146_v25  ;;  %2207 = vmatmul.msk.bf16.vlgmr.msrb.gmra.mxu0 %vm239_vm0, %v1612_v16 }
 0x4a0   :  { %v1609_v60 = vpop.f32.mrf.mxu3 }
 0x4a1   :  { %v1613_v30 = vpack.c.bf16 %v1609_v60, %v1607_v55 }
 0x4a2   :  { %v2781_v29 = vpop.f32.mrf.mxu1 }
 0x4a6   :  { %v1186_v11 = vpop.f32.mrf.mxu2 }
 0x4a7   :  { %v1187_v62 = vadd.f32 %v1186_v11, %v1149_v12 }
 0x4aa   :  { %v1267_v5 = vpop.f32.mrf.mxu1 }
 0x4ae   :  { %v1188_v25 = vpop.f32.mrf.mxu2 }
 0x4af   :  { %2208 = vmatmul.msk.bf16.gmra.mxu0 %vm239_vm0, %v1613_v30  ;;  %v1189_v54 = vadd.f32 %v1188_v25, %v2781_v29 }
 0x4b0   :  { %v1244_v7 = vpop.f32.mrf.mxu0 }
 0x4b1   :  { %v2793_v26 = vadd.f32 %v1244_v7, %v1182_v2 }
 0x4b2   :  { %v1269_v34 = vpop.f32.mrf.mxu1 }
 0x4b3   :  { %v1277_v37 = vpack.c.bf16 %v1269_v34, %v1267_v5 }
 0x4b5   :  { %2127 = vmatmul.msk.bf16.vlgmr.msra.gmra.mxu2 %vm239_vm0, %v1277_v37 }
 0x4b6   :  { %1576 = vmatpush.bf16.msra.mxu2 %v2285_v58 }
 0x4b8   :  { %v1246_v48 = vpop.f32.mrf.mxu0 }
 0x4b9   :  { %v2799_v49 = vadd.f32 %v1246_v48, %v1184_v27 }
 0x4ba   :  { %v1272_v50 = vpop.f32.mrf.mxu1  ;;  %1577 = vmatpush.bf16.msra.mxu2 %v2284_v20 }
 0x4c0   :  { %v1249_v43 = vpop.f32.mrf.mxu0 }
 0x4c1   :  { %v2802_v44 = vadd.f32 %v1249_v43, %v1187_v62 }
 0x4c2   :  { %v1274_v52 = vpop.f32.mrf.mxu1 }
 0x4c3   :  { %v1278_v53 = vpack.c.bf16 %v1274_v52, %v1272_v50 }
 0x4c5   :  { %2128 = vmatmul.msk.bf16.gmra.mxu2 %vm239_vm0, %v1278_v53 }
 0x4c8   :  { %v1251_v0 = vpop.f32.mrf.mxu0 }
 0x4c9   :  { %v1257_v58 = vadd.f32 %v1251_v0, %v1189_v54 }
 0x4ca   :  { %v1401_v57 = vpop.f32.mrf.mxu1 }
 0x4d2   :  { %v1403_v18 = vpop.f32.mrf.mxu1 }
 0x4d3   :  { %v1411_v51 = vpack.c.bf16 %v1403_v18, %v1401_v57 }
 0x4d5   :  { %2159 = vmatmul.msk.bf16.vlgmr.msrb.gmra.mxu2 %vm239_vm0, %v1411_v51 }
 0x4da   :  { %v1406_v59 = vpop.f32.mrf.mxu1 }
 0x4dc   :  { %v1378_v23 = vpop.f32.mrf.mxu0 }
 0x4e2   :  { %v1408_v31 = vpop.f32.mrf.mxu1 }
 0x4e3   :  { %v1412_v22 = vpack.c.bf16 %v1408_v31, %v1406_v59 }
 0x4e4   :  { %v1380_v24 = vpop.f32.mrf.mxu0 }
 0x4e5   :  { %2160 = vmatmul.msk.bf16.gmra.mxu2 %vm239_vm0, %v1412_v22 }
 0x4ea   :  { %v1535_v32 = vpop.f32.mrf.mxu1 }
 0x4ec   :  { %v1383_v6 = vpop.f32.mrf.mxu0 }
 0x4f2   :  { %v1537_v61 = vpop.f32.mrf.mxu1 }
 0x4f3   :  { %v1545_v17 = vpack.c.bf16 %v1537_v61, %v1535_v32 }
 0x4f4   :  { %v1385_v2 = vpop.f32.mrf.mxu0 }
 0x4f5   :  { %2191 = vmatmul.msk.bf16.vlgmr.msra.gmra.mxu2 %vm239_vm0, %v1545_v17 }
 0x4fa   :  { %v1540_v19 = vpop.f32.mrf.mxu1 }
 0x4fc   :  { %v1512_v13 = vpop.f32.mrf.mxu0 }
 0x502   :  { %v1542_v63 = vpop.f32.mrf.mxu1 }
 0x503   :  { %v1546_v21 = vpack.c.bf16 %v1542_v63, %v1540_v19 }
 0x504   :  { %v1514_v8 = vpop.f32.mrf.mxu0 }
 0x505   :  { %2192 = vmatmul.msk.bf16.gmra.mxu2 %vm239_vm0, %v1546_v21 }
 0x50c   :  { %v1517_v46 = vpop.f32.mrf.mxu0 }
 0x514   :  { %v1519_v5 = vpop.f32.mrf.mxu0 }
 0x51c   :  { %v1646_v7 = vpop.f32.mrf.mxu0 }
 0x524   :  { %v1648_v52 = vpop.f32.mrf.mxu0 }
 0x538   :  { %v1311_v4 = vpop.f32.mrf.mxu2 }
 0x539   :  { %v1321_v3 = vadd.f32 %v1311_v4, %v2793_v26 }
 0x53b   :  { %v1388_v35 = vadd.f32 %v1378_v23, %v1321_v3 }
 0x540   :  { %v1313_v9 = vpop.f32.mrf.mxu2 }
 0x541   :  { %v1322_v34 = vadd.f32 %v1313_v9, %v2799_v49 }
 0x543   :  { %v1389_v47 = vadd.f32 %v1380_v24, %v1322_v34 }
 0x548   :  { %v1316_v12 = vpop.f32.mrf.mxu2 }
 0x549   :  { %v1323_v42 = vadd.f32 %v1316_v12, %v2802_v44  ;;  %v1651_v44 = vpop.f32.mrf.mxu0 }
 0x54b   :  { %v1390_v56 = vadd.f32 %v1383_v6, %v1323_v42 }
 0x550   :  { %v1318_v1 = vpop.f32.mrf.mxu2 }
 0x551   :  { %v1324_v15 = vadd.f32 %v1318_v1, %v1257_v58  ;;  %v1653_v32 = vpop.f32.mrf.mxu0 }
 0x553   :  { %v1391_v51 = vadd.f32 %v1385_v2, %v1324_v15 }
 0x558   :  { %v1445_v27 = vpop.f32.mrf.mxu2 }
 0x559   :  { %v1455_v10 = vadd.f32 %v1445_v27, %v1388_v35 }
 0x55b   :  { %v1522_v40 = vadd.f32 %v1512_v13, %v1455_v10 }
 0x560   :  { %v1447_v11 = vpop.f32.mrf.mxu2 }
 0x561   :  { %v1456_v50 = vadd.f32 %v1447_v11, %v1389_v47 }
 0x563   :  { %v1523_v53 = vadd.f32 %v1514_v8, %v1456_v50 }
 0x568   :  { %v1450_v62 = vpop.f32.mrf.mxu2 }
 0x569   :  { %v1457_v49 = vadd.f32 %v1450_v62, %v1390_v56 }
 0x56b   :  { %v1524_v18 = vadd.f32 %v1517_v46, %v1457_v49 }
 0x570   :  { %v1452_v28 = vpop.f32.mrf.mxu2 }
 0x571   :  { %v1458_v59 = vadd.f32 %v1452_v28, %v1391_v51 }
 0x573   :  { %v1525_v31 = vadd.f32 %v1519_v5, %v1458_v59 }
 0x578   :  { %v1579_v37 = vpop.f32.mrf.mxu2 }
 0x579   :  { %v1589_v48 = vadd.f32 %v1579_v37, %v1522_v40 }
 0x57b   :  { %v1656_v39 = vadd.f32 %v1646_v7, %v1589_v48 }
 0x57d   :  { %v1660_v43 = vmax.f32 %v1656_v39, 0.0 }
 0x57f   :  { %2210 = vmatmul.msk.f32.vlgmr.msrb.gmra.mxu1 %vm1013_vm1, %v1660_v43 }
 0x580   :  { %v1581_v26 = vpop.f32.mrf.mxu2 }
 0x581   :  { %v1590_v57 = vadd.f32 %v1581_v26, %v1523_v53 }
 0x583   :  { %v1657_v14 = vadd.f32 %v1648_v52, %v1590_v57 }
 0x585   :  { %v1661_v16 = vmax.f32 %v1657_v14, 0.0 }
 0x587   :  { %2211 = vmatmul.msk.f32.gmra.mxu1 %vm1013_vm1, %v1661_v16 }
 0x588   :  { %v1584_v20 = vpop.f32.mrf.mxu2 }
 0x589   :  { %v1591_v55 = vadd.f32 %v1584_v20, %v1524_v18 }
 0x58b   :  { %v1658_v60 = vadd.f32 %v1651_v44, %v1591_v55 }
 0x58d   :  { %v1662_v30 = vmax.f32 %v1658_v60, 0.0 }
 0x58f   :  { %2212 = vmatmul.msk.f32.gmra.mxu1 %vm1013_vm1, %v1662_v30 }
 0x590   :  { %v1586_v29 = vpop.f32.mrf.mxu2 }
 0x591   :  { %v1592_v22 = vadd.f32 %v1586_v29, %v1525_v31 }
 0x593   :  { %v1659_v61 = vadd.f32 %v1653_v32, %v1592_v22 }
 0x595   :  { %v1663_v17 = vmax.f32 %v1659_v61, 0.0 }
 0x597   :  { %2213 = vmatmul.msk.f32.gmra.mxu1 %vm1013_vm1, %v1663_v17 }
 0x5fc   :  { %v1695_v19 = vpop.f32.mrf.mxu1 }
 0x5fd   :  { %v1707_v63 = vadd.f32 %v1695_v19, %v2707_v45 }
 0x5ff   :  { %v1711_v21 = vmax.f32 %v1707_v63, 0.0 }
 0x601   :  { %1715 = vst.msk [vmem:[#allocation2] sm:$0xff] %vm239_vm0, %v1711_v21 }
 0x604   :  { %v1698_v0 = vpop.f32.mrf.mxu1 }
 0x605   :  { %v1708_v23 = vadd.f32 %v1698_v0, %v2701_v38 }
 0x607   :  { %v1712_v24 = vmax.f32 %v1708_v23, 0.0 }
 0x609   :  { %1716 = vst.msk [vmem:[#allocation2 + $0x8] sm:$0xff] %vm239_vm0, %v1712_v24 }
 0x60c   :  { %v1701_v25 = vpop.f32.mrf.mxu1 }
 0x60d   :  { %v1709_v4 = vadd.f32 %v1701_v25, %v2698_v36 }
 0x60f   :  { %v1713_v6 = vmax.f32 %v1709_v4, 0.0 }
 0x611   :  { %1717 = vst.msk [vmem:[#allocation2 + $0x10] sm:$0xff] %vm239_vm0, %v1713_v6 }
 0x614   :  { %v1704_v45 = vpop.f32.mrf.mxu1 }
 0x615   :  { %v1710_v9 = vadd.f32 %v1704_v45, %v2704_v41 }
 0x617   :  { %v1714_v38 = vmax.f32 %v1710_v9, 0.0 }
 0x619   :  { %1718 = vst.msk [vmem:[#allocation2 + $0x18] sm:$0xff] %vm239_vm0, %v1714_v38 }
 0x61a   :  { %1731 = dma.vmem_to_hbm [thread:$0]  %s1724_s0, 512, %s1726_s23, [#allocation3], %s2323_s24, %s2323_s24, %s2324_s25  }
 0x61b   :  { %2320 = dma.done.wait [#allocation3], 512  }
 0x61c   :  { %2321 = vsyncadd [#allocation3], 4294966784 }
 0x61d   :  { %1736 = vsyncpa [#allocation3], 1 }

</bundles_post_ra>
